<compile_context>
chip_gen: v7x
topology: tpu7x:2x2x1
jax: 0.10.0
libtpu: 0.0.40
codegen_flags: <defaults>
</compile_context>

<pallas_src>
import numpy as np
import jax
import jax.numpy as jnp
from jax import lax
from jax.experimental import pallas as pl
from jax.experimental.pallas import tpu as pltpu

KH = KW = 7
PAD = 3
CIN_CAT = 2        # [avg, max]
LANE = 128


def _make_kernel(W, hwp):
    def kernel(b_ref, wm_ref, rmask_ref, x_ref, o_ref):
        # b_ref:     (1,)                SMEM  conv bias
        # wm_ref:    (2*KH*KW, 1, HWp)   VMEM  weights with column-validity mask folded in
        # rmask_ref: (KH, 1, HWp)        VMEM  row-validity masks (H boundary)
        # x_ref:     (nb, C, HWp)        VMEM  lane-dense input block
        # o_ref:     (nb, HWp)           VMEM  lane-dense output block
        x = x_ref[...].astype(jnp.float32)
        inv_c = jnp.float32(1.0 / x.shape[1])
        avg = jnp.sum(x, axis=1) * inv_c          # (nb, HWp), sublane+lane dense
        mx = jnp.max(x, axis=1)                   # (nb, HWp)

        # r[..., p] = v[..., p + s] (wrapping; wrapped lanes are masked later /
        # via the folded weights).  Rolls go to the XLU, off the VALU path.
        def lshift(v, s):
            s = (-s) % hwp
            return v if s == 0 else pltpu.roll(v, s, axis=1)

        # Hoisted width (lane-axis) shifts, shared across all 7 kernel rows.
        sh_a = [lshift(avg, kw - PAD) for kw in range(KW)]
        sh_m = [lshift(mx, kw - PAD) for kw in range(KW)]

        acc0 = None
        acc1 = None
        for kh in range(KH):
            dh = kh - PAD
            base = kh * KW
            # Combine both channels' weighted kw-contributions for this kernel
            # row BEFORE the single height shift; two q accumulators for ILP.
            qa = sh_a[0] * wm_ref[base] + sh_m[0] * wm_ref[KH * KW + base]
            qb = sh_a[1] * wm_ref[base + 1] + sh_m[1] * wm_ref[KH * KW + base + 1]
            for kw in range(2, KW):
                t = sh_a[kw] * wm_ref[base + kw] + sh_m[kw] * wm_ref[KH * KW + base + kw]
                if kw % 2 == 0:
                    qa = qa + t
                else:
                    qb = qb + t
            q = qa + qb
            if dh != 0:
                # One height shift by dh*W lanes; mask the rows that wrapped
                # across the top/bottom boundary (this is the H padding).
                q = lshift(q, dh * W) * rmask_ref[kh]
            if kh % 2 == 0:
                acc0 = q if acc0 is None else acc0 + q
            else:
                acc1 = q if acc1 is None else acc1 + q

        out = acc0 + acc1 + b_ref[0]
        o_ref[...] = jax.nn.sigmoid(out).astype(o_ref.dtype)

    return kernel


def _pick_block_n(n, c, hwp, budget_bytes=12 << 20):
    """Batch block size.

    Legal blocks: the full batch, or a multiple-of-8 divisor of N (so the
    (nb, HWp) output block satisfies the (8,128) rule and planes are
    sublane-dense).  The budget counts the double-buffered input block AND
    ~24 live (nb, HWp) intermediate planes, so intermediates cannot blow the
    scoped VMEM limit (matters most on v7x's 64 MiB VMEM).  For large N we
    prefer >=2 (ideally even) grid steps so both v7x TensorCores get work;
    on single-TC v5e/v6e the extra step costs only ~0.35 us.
    """
    per_img = (3 * c + 24) * hwp * 4
    legal = sorted({d for d in range(8, n + 1, 8) if n % d == 0} | {n})
    fits = [d for d in legal if d * per_img <= budget_bytes]
    if not fits:
        return legal[0]
    nb = max(fits)
    if n >= 16:
        multi = [d for d in fits if n // d >= 2]
        if multi:
            even = [d for d in multi if (n // d) % 2 == 0]
            nb = max(even) if even else max(multi)
    return nb


def spatial_attention(x, weight, bias):
    """x: (N, C, H, W); weight: (1, 2, 7, 7); bias: (1,) -> (N, 1, H, W) f32."""
    N, C, H, W = x.shape
    HW = H * W
    HWp = max(LANE, ((HW + LANE - 1) // LANE) * LANE)   # lane-dense padded length

    # ---- host-side precompute (masks + folded weights) --------------------
    p = np.arange(HWp)
    col = p % W
    row = p // W
    real = p < HW
    # column-validity per width shift (folded into the weight planes below)
    cmask = np.stack(
        [real & (col + (kw - PAD) >= 0) & (col + (kw - PAD) < W) for kw in range(KW)]
    ).astype(np.float32)                                              # (KW, HWp)
    # row-validity per height shift (applied after the wrapping lane roll)
    rmask = np.stack(
        [real & (row + (kh - PAD) >= 0) & (row + (kh - PAD) < H) for kh in range(KH)]
    ).astype(np.float32)                                              # (KH, HWp)
    rmask_j = jnp.asarray(rmask).reshape(KH, 1, HWp)

    w = weight.astype(jnp.float32).reshape(CIN_CAT, KH, KW)
    wm = w[:, :, :, None] * jnp.asarray(cmask)[None, None, :, :]      # (2,KH,KW,HWp)
    wm = wm.reshape(CIN_CAT * KH * KW, 1, HWp)                        # [ci, kh, kw] order
    b = bias.astype(jnp.float32).reshape(-1)

    # ---- lane-dense (padded) input view ------------------------------------
    x_flat = x.reshape(N, C, HW)
    if HWp != HW:
        x_flat = jnp.pad(x_flat, ((0, 0), (0, 0), (0, HWp - HW)))

    nb = _pick_block_n(N, C, HWp)
    grid = (N // nb,)

    grid_spec = pltpu.PrefetchScalarGridSpec(
        num_scalar_prefetch=0,
        grid=grid,
        in_specs=[
            pl.BlockSpec(memory_space=pltpu.MemorySpace.SMEM),               # bias
            pl.BlockSpec((CIN_CAT * KH * KW, 1, HWp), lambda i: (0, 0, 0)),  # folded weights
            pl.BlockSpec((KH, 1, HWp), lambda i: (0, 0, 0)),                 # row masks
            pl.BlockSpec((nb, C, HWp), lambda i: (i, 0, 0)),                 # input block
        ],
        out_specs=pl.BlockSpec((nb, HWp), lambda i: (i, 0)),
    )

    cost = pl.CostEstimate(
        flops=int(N * HW * (2 * C + 2 * CIN_CAT * KH * KW)),
        transcendentals=int(N * HW),
        bytes_accessed=int(N * C * HW * x.dtype.itemsize + N * HW * 4
                           + (CIN_CAT * KH * KW + KH) * HWp * 4 + 4),
    )

    out_flat = pl.pallas_call(
        _make_kernel(W, HWp),
        out_shape=jax.ShapeDtypeStruct((N, HWp), jnp.float32),
        grid_spec=grid_spec,
        compiler_params=pltpu.CompilerParams(
            dimension_semantics=("parallel",),
            vmem_limit_bytes=32 << 20,
        ),
        cost_estimate=cost,
    )(b, wm, rmask_j, x_flat)

    return out_flat[:, :HW].reshape(N, 1, H, W)


def _reference(x, weight, bias):
    avg = jnp.mean(x, axis=1, keepdims=True)
    mx = jnp.max(x, axis=1, keepdims=True)
    cat = jnp.concatenate([avg, mx], axis=1)  # (N, 2, H, W)
    y = lax.conv_general_dilated(
        cat, weight, window_strides=(1, 1),
        padding=((PAD, PAD), (PAD, PAD)),
        dimension_numbers=("NCHW", "OIHW", "NCHW"),
    ) + bias.reshape(1, 1, 1, 1)
    return jax.nn.sigmoid(y)


if __name__ == "__main__":
    key = jax.random.PRNGKey(0)
    kx, kw_, kb = jax.random.split(key, 3)

    N, C, H, W = 2, 4, 16, 16
    x = jax.random.normal(kx, (N, C, H, W), dtype=jnp.float32)

    # Deterministic init mimicking nn.Conv2d default (uniform in +/- 1/sqrt(fan_in)).
    fan_in = CIN_CAT * KH * KW
    bound = 1.0 / (fan_in ** 0.5)
    weight = jax.random.uniform(kw_, (1, CIN_CAT, KH, KW), jnp.float32, -bound, bound)
    bias = jax.random.uniform(kb, (1,), jnp.float32, -bound, bound)

    out = spatial_attention(x, weight, bias)
    out = jax.block_until_ready(out)

    ref = _reference(x, weight, bias)
    assert out.shape == (N, 1, H, W)
    assert jnp.allclose(out, ref, atol=1e-5, rtol=1e-5), float(jnp.max(jnp.abs(out - ref)))
    print("KERNEL_OK")
</pallas_src>

<mosaic_0001>
module attributes {stable_mosaic.version = 11 : i64} {
  func.func @kernel(%arg0: i32, %arg1: memref<1xf32, #tpu.memory_space<smem>>, %arg2: memref<98x1x256xf32, #tpu.memory_space<vmem>>, %arg3: memref<7x1x256xf32, #tpu.memory_space<vmem>>, %arg4: memref<2x4x256xf32, #tpu.memory_space<vmem>>, %arg5: memref<2x256xf32, #tpu.memory_space<vmem>>) attributes {dimension_semantics = [#tpu.dimension_semantics<parallel>], iteration_bounds = array<i64: 1>, scalar_prefetch = 0 : i64, scratch_operands = 0 : i64, tpu.core_type = #tpu.core_type<tc>, window_params = [{transform_indices = @transform_0, window_bounds = array<i64: 1>}, {pipeline_mode = #tpu.pipeline_mode<synchronous>, transform_indices = @transform_1, window_bounds = array<i64: 98, 1, 256>}, {pipeline_mode = #tpu.pipeline_mode<synchronous>, transform_indices = @transform_2, window_bounds = array<i64: 7, 1, 256>}, {transform_indices = @transform_3, window_bounds = array<i64: 2, 4, 256>}, {transform_indices = @transform_4, window_bounds = array<i64: 2, 256>}]} {
    %c0 = arith.constant 0 : index
    %c0_0 = arith.constant 0 : index
    %c0_1 = arith.constant 0 : index
    %0 = vector.load %arg4[%c0, %c0_0, %c0_1] : memref<2x4x256xf32, #tpu.memory_space<vmem>>, vector<2x4x256xf32>
    %cst = arith.constant dense<0.000000e+00> : vector<2x256xf32>
    %1 = vector.multi_reduction <add>, %0, %cst [1] : vector<2x4x256xf32> to vector<2x256xf32>
    %cst_2 = arith.constant 2.500000e-01 : f32
    %2 = vector.broadcast %cst_2 : f32 to vector<2x256xf32>
    %3 = arith.mulf %1, %2 : vector<2x256xf32>
    %cst_3 = arith.constant dense<0xFF800000> : vector<2x256xf32>
    %4 = vector.multi_reduction <maximumf>, %0, %cst_3 [1] : vector<2x4x256xf32> to vector<2x256xf32>
    %c3_i32 = arith.constant 3 : i32
    %5 = tpu.dynamic_rotate %3 by %c3_i32 dim 1 : vector<2x256xf32>, i32 -> vector<2x256xf32>
    %c2_i32 = arith.constant 2 : i32
    %6 = tpu.dynamic_rotate %3 by %c2_i32 dim 1 : vector<2x256xf32>, i32 -> vector<2x256xf32>
    %c1_i32 = arith.constant 1 : i32
    %7 = tpu.dynamic_rotate %3 by %c1_i32 dim 1 : vector<2x256xf32>, i32 -> vector<2x256xf32>
    %c255_i32 = arith.constant 255 : i32
    %8 = tpu.dynamic_rotate %3 by %c255_i32 dim 1 : vector<2x256xf32>, i32 -> vector<2x256xf32>
    %c254_i32 = arith.constant 254 : i32
    %9 = tpu.dynamic_rotate %3 by %c254_i32 dim 1 : vector<2x256xf32>, i32 -> vector<2x256xf32>
    %c253_i32 = arith.constant 253 : i32
    %10 = tpu.dynamic_rotate %3 by %c253_i32 dim 1 : vector<2x256xf32>, i32 -> vector<2x256xf32>
    %c3_i32_4 = arith.constant 3 : i32
    %11 = tpu.dynamic_rotate %4 by %c3_i32_4 dim 1 : vector<2x256xf32>, i32 -> vector<2x256xf32>
    %c2_i32_5 = arith.constant 2 : i32
    %12 = tpu.dynamic_rotate %4 by %c2_i32_5 dim 1 : vector<2x256xf32>, i32 -> vector<2x256xf32>
    %c1_i32_6 = arith.constant 1 : i32
    %13 = tpu.dynamic_rotate %4 by %c1_i32_6 dim 1 : vector<2x256xf32>, i32 -> vector<2x256xf32>
    %c255_i32_7 = arith.constant 255 : i32
    %14 = tpu.dynamic_rotate %4 by %c255_i32_7 dim 1 : vector<2x256xf32>, i32 -> vector<2x256xf32>
    %c254_i32_8 = arith.constant 254 : i32
    %15 = tpu.dynamic_rotate %4 by %c254_i32_8 dim 1 : vector<2x256xf32>, i32 -> vector<2x256xf32>
    %c253_i32_9 = arith.constant 253 : i32
    %16 = tpu.dynamic_rotate %4 by %c253_i32_9 dim 1 : vector<2x256xf32>, i32 -> vector<2x256xf32>
    %c0_10 = arith.constant 0 : index
    %c0_11 = arith.constant 0 : index
    %c0_12 = arith.constant 0 : index
    %17 = vector.load %arg2[%c0_10, %c0_11, %c0_12] : memref<98x1x256xf32, #tpu.memory_space<vmem>>, vector<1x1x256xf32>
    %18 = vector.shape_cast %17 : vector<1x1x256xf32> to vector<1x256xf32>
    %19 = vector.broadcast %18 : vector<1x256xf32> to vector<2x256xf32>
    %20 = arith.mulf %5, %19 : vector<2x256xf32>
    %c49 = arith.constant 49 : index
    %c0_13 = arith.constant 0 : index
    %c0_14 = arith.constant 0 : index
    %21 = vector.load %arg2[%c49, %c0_13, %c0_14] : memref<98x1x256xf32, #tpu.memory_space<vmem>>, vector<1x1x256xf32>
    %22 = vector.shape_cast %21 : vector<1x1x256xf32> to vector<1x256xf32>
    %23 = vector.broadcast %22 : vector<1x256xf32> to vector<2x256xf32>
    %24 = arith.mulf %11, %23 : vector<2x256xf32>
    %25 = arith.addf %20, %24 : vector<2x256xf32>
    %c1 = arith.constant 1 : index
    %c0_15 = arith.constant 0 : index
    %c0_16 = arith.constant 0 : index
    %26 = vector.load %arg2[%c1, %c0_15, %c0_16] : memref<98x1x256xf32, #tpu.memory_space<vmem>>, vector<1x1x256xf32>
    %27 = vector.shape_cast %26 : vector<1x1x256xf32> to vector<1x256xf32>
    %28 = vector.broadcast %27 : vector<1x256xf32> to vector<2x256xf32>
    %29 = arith.mulf %6, %28 : vector<2x256xf32>
    %c50 = arith.constant 50 : index
    %c0_17 = arith.constant 0 : index
    %c0_18 = arith.constant 0 : index
    %30 = vector.load %arg2[%c50, %c0_17, %c0_18] : memref<98x1x256xf32, #tpu.memory_space<vmem>>, vector<1x1x256xf32>
    %31 = vector.shape_cast %30 : vector<1x1x256xf32> to vector<1x256xf32>
    %32 = vector.broadcast %31 : vector<1x256xf32> to vector<2x256xf32>
    %33 = arith.mulf %12, %32 : vector<2x256xf32>
    %34 = arith.addf %29, %33 : vector<2x256xf32>
    %c2 = arith.constant 2 : index
    %c0_19 = arith.constant 0 : index
    %c0_20 = arith.constant 0 : index
    %35 = vector.load %arg2[%c2, %c0_19, %c0_20] : memref<98x1x256xf32, #tpu.memory_space<vmem>>, vector<1x1x256xf32>
    %36 = vector.shape_cast %35 : vector<1x1x256xf32> to vector<1x256xf32>
    %37 = vector.broadcast %36 : vector<1x256xf32> to vector<2x256xf32>
    %38 = arith.mulf %7, %37 : vector<2x256xf32>
    %c51 = arith.constant 51 : index
    %c0_21 = arith.constant 0 : index
    %c0_22 = arith.constant 0 : index
    %39 = vector.load %arg2[%c51, %c0_21, %c0_22] : memref<98x1x256xf32, #tpu.memory_space<vmem>>, vector<1x1x256xf32>
    %40 = vector.shape_cast %39 : vector<1x1x256xf32> to vector<1x256xf32>
    %41 = vector.broadcast %40 : vector<1x256xf32> to vector<2x256xf32>
    %42 = arith.mulf %13, %41 : vector<2x256xf32>
    %43 = arith.addf %38, %42 : vector<2x256xf32>
    %44 = arith.addf %25, %43 : vector<2x256xf32>
    %c3 = arith.constant 3 : index
    %c0_23 = arith.constant 0 : index
    %c0_24 = arith.constant 0 : index
    %45 = vector.load %arg2[%c3, %c0_23, %c0_24] : memref<98x1x256xf32, #tpu.memory_space<vmem>>, vector<1x1x256xf32>
    %46 = vector.shape_cast %45 : vector<1x1x256xf32> to vector<1x256xf32>
    %47 = vector.broadcast %46 : vector<1x256xf32> to vector<2x256xf32>
    %48 = arith.mulf %3, %47 : vector<2x256xf32>
    %c52 = arith.constant 52 : index
    %c0_25 = arith.constant 0 : index
    %c0_26 = arith.constant 0 : index
    %49 = vector.load %arg2[%c52, %c0_25, %c0_26] : memref<98x1x256xf32, #tpu.memory_space<vmem>>, vector<1x1x256xf32>
    %50 = vector.shape_cast %49 : vector<1x1x256xf32> to vector<1x256xf32>
    %51 = vector.broadcast %50 : vector<1x256xf32> to vector<2x256xf32>
    %52 = arith.mulf %4, %51 : vector<2x256xf32>
    %53 = arith.addf %48, %52 : vector<2x256xf32>
    %54 = arith.addf %34, %53 : vector<2x256xf32>
    %c4 = arith.constant 4 : index
    %c0_27 = arith.constant 0 : index
    %c0_28 = arith.constant 0 : index
    %55 = vector.load %arg2[%c4, %c0_27, %c0_28] : memref<98x1x256xf32, #tpu.memory_space<vmem>>, vector<1x1x256xf32>
    %56 = vector.shape_cast %55 : vector<1x1x256xf32> to vector<1x256xf32>
    %57 = vector.broadcast %56 : vector<1x256xf32> to vector<2x256xf32>
    %58 = arith.mulf %8, %57 : vector<2x256xf32>
    %c53 = arith.constant 53 : index
    %c0_29 = arith.constant 0 : index
    %c0_30 = arith.constant 0 : index
    %59 = vector.load %arg2[%c53, %c0_29, %c0_30] : memref<98x1x256xf32, #tpu.memory_space<vmem>>, vector<1x1x256xf32>
    %60 = vector.shape_cast %59 : vector<1x1x256xf32> to vector<1x256xf32>
    %61 = vector.broadcast %60 : vector<1x256xf32> to vector<2x256xf32>
    %62 = arith.mulf %14, %61 : vector<2x256xf32>
    %63 = arith.addf %58, %62 : vector<2x256xf32>
    %64 = arith.addf %44, %63 : vector<2x256xf32>
    %c5 = arith.constant 5 : index
    %c0_31 = arith.constant 0 : index
    %c0_32 = arith.constant 0 : index
    %65 = vector.load %arg2[%c5, %c0_31, %c0_32] : memref<98x1x256xf32, #tpu.memory_space<vmem>>, vector<1x1x256xf32>
    %66 = vector.shape_cast %65 : vector<1x1x256xf32> to vector<1x256xf32>
    %67 = vector.broadcast %66 : vector<1x256xf32> to vector<2x256xf32>
    %68 = arith.mulf %9, %67 : vector<2x256xf32>
    %c54 = arith.constant 54 : index
    %c0_33 = arith.constant 0 : index
    %c0_34 = arith.constant 0 : index
    %69 = vector.load %arg2[%c54, %c0_33, %c0_34] : memref<98x1x256xf32, #tpu.memory_space<vmem>>, vector<1x1x256xf32>
    %70 = vector.shape_cast %69 : vector<1x1x256xf32> to vector<1x256xf32>
    %71 = vector.broadcast %70 : vector<1x256xf32> to vector<2x256xf32>
    %72 = arith.mulf %15, %71 : vector<2x256xf32>
    %73 = arith.addf %68, %72 : vector<2x256xf32>
    %74 = arith.addf %54, %73 : vector<2x256xf32>
    %c6 = arith.constant 6 : index
    %c0_35 = arith.constant 0 : index
    %c0_36 = arith.constant 0 : index
    %75 = vector.load %arg2[%c6, %c0_35, %c0_36] : memref<98x1x256xf32, #tpu.memory_space<vmem>>, vector<1x1x256xf32>
    %76 = vector.shape_cast %75 : vector<1x1x256xf32> to vector<1x256xf32>
    %77 = vector.broadcast %76 : vector<1x256xf32> to vector<2x256xf32>
    %78 = arith.mulf %10, %77 : vector<2x256xf32>
    %c55 = arith.constant 55 : index
    %c0_37 = arith.constant 0 : index
    %c0_38 = arith.constant 0 : index
    %79 = vector.load %arg2[%c55, %c0_37, %c0_38] : memref<98x1x256xf32, #tpu.memory_space<vmem>>, vector<1x1x256xf32>
    %80 = vector.shape_cast %79 : vector<1x1x256xf32> to vector<1x256xf32>
    %81 = vector.broadcast %80 : vector<1x256xf32> to vector<2x256xf32>
    %82 = arith.mulf %16, %81 : vector<2x256xf32>
    %83 = arith.addf %78, %82 : vector<2x256xf32>
    %84 = arith.addf %64, %83 : vector<2x256xf32>
    %85 = arith.addf %84, %74 : vector<2x256xf32>
    %c48_i32 = arith.constant 48 : i32
    %86 = tpu.dynamic_rotate %85 by %c48_i32 dim 1 : vector<2x256xf32>, i32 -> vector<2x256xf32>
    %c0_39 = arith.constant 0 : index
    %c0_40 = arith.constant 0 : index
    %c0_41 = arith.constant 0 : index
    %87 = vector.load %arg3[%c0_39, %c0_40, %c0_41] : memref<7x1x256xf32, #tpu.memory_space<vmem>>, vector<1x1x256xf32>
    %88 = vector.shape_cast %87 : vector<1x1x256xf32> to vector<1x256xf32>
    %89 = vector.broadcast %88 : vector<1x256xf32> to vector<2x256xf32>
    %90 = arith.mulf %86, %89 : vector<2x256xf32>
    %c7 = arith.constant 7 : index
    %c0_42 = arith.constant 0 : index
    %c0_43 = arith.constant 0 : index
    %91 = vector.load %arg2[%c7, %c0_42, %c0_43] : memref<98x1x256xf32, #tpu.memory_space<vmem>>, vector<1x1x256xf32>
    %92 = vector.shape_cast %91 : vector<1x1x256xf32> to vector<1x256xf32>
    %93 = vector.broadcast %92 : vector<1x256xf32> to vector<2x256xf32>
    %94 = arith.mulf %5, %93 : vector<2x256xf32>
    %c56 = arith.constant 56 : index
    %c0_44 = arith.constant 0 : index
    %c0_45 = arith.constant 0 : index
    %95 = vector.load %arg2[%c56, %c0_44, %c0_45] : memref<98x1x256xf32, #tpu.memory_space<vmem>>, vector<1x1x256xf32>
    %96 = vector.shape_cast %95 : vector<1x1x256xf32> to vector<1x256xf32>
    %97 = vector.broadcast %96 : vector<1x256xf32> to vector<2x256xf32>
    %98 = arith.mulf %11, %97 : vector<2x256xf32>
    %99 = arith.addf %94, %98 : vector<2x256xf32>
    %c8 = arith.constant 8 : index
    %c0_46 = arith.constant 0 : index
    %c0_47 = arith.constant 0 : index
    %100 = vector.load %arg2[%c8, %c0_46, %c0_47] : memref<98x1x256xf32, #tpu.memory_space<vmem>>, vector<1x1x256xf32>
    %101 = vector.shape_cast %100 : vector<1x1x256xf32> to vector<1x256xf32>
    %102 = vector.broadcast %101 : vector<1x256xf32> to vector<2x256xf32>
    %103 = arith.mulf %6, %102 : vector<2x256xf32>
    %c57 = arith.constant 57 : index
    %c0_48 = arith.constant 0 : index
    %c0_49 = arith.constant 0 : index
    %104 = vector.load %arg2[%c57, %c0_48, %c0_49] : memref<98x1x256xf32, #tpu.memory_space<vmem>>, vector<1x1x256xf32>
    %105 = vector.shape_cast %104 : vector<1x1x256xf32> to vector<1x256xf32>
    %106 = vector.broadcast %105 : vector<1x256xf32> to vector<2x256xf32>
    %107 = arith.mulf %12, %106 : vector<2x256xf32>
    %108 = arith.addf %103, %107 : vector<2x256xf32>
    %c9 = arith.constant 9 : index
    %c0_50 = arith.constant 0 : index
    %c0_51 = arith.constant 0 : index
    %109 = vector.load %arg2[%c9, %c0_50, %c0_51] : memref<98x1x256xf32, #tpu.memory_space<vmem>>, vector<1x1x256xf32>
    %110 = vector.shape_cast %109 : vector<1x1x256xf32> to vector<1x256xf32>
    %111 = vector.broadcast %110 : vector<1x256xf32> to vector<2x256xf32>
    %112 = arith.mulf %7, %111 : vector<2x256xf32>
    %c58 = arith.constant 58 : index
    %c0_52 = arith.constant 0 : index
    %c0_53 = arith.constant 0 : index
    %113 = vector.load %arg2[%c58, %c0_52, %c0_53] : memref<98x1x256xf32, #tpu.memory_space<vmem>>, vector<1x1x256xf32>
    %114 = vector.shape_cast %113 : vector<1x1x256xf32> to vector<1x256xf32>
    %115 = vector.broadcast %114 : vector<1x256xf32> to vector<2x256xf32>
    %116 = arith.mulf %13, %115 : vector<2x256xf32>
    %117 = arith.addf %112, %116 : vector<2x256xf32>
    %118 = arith.addf %99, %117 : vector<2x256xf32>
    %c10 = arith.constant 10 : index
    %c0_54 = arith.constant 0 : index
    %c0_55 = arith.constant 0 : index
    %119 = vector.load %arg2[%c10, %c0_54, %c0_55] : memref<98x1x256xf32, #tpu.memory_space<vmem>>, vector<1x1x256xf32>
    %120 = vector.shape_cast %119 : vector<1x1x256xf32> to vector<1x256xf32>
    %121 = vector.broadcast %120 : vector<1x256xf32> to vector<2x256xf32>
    %122 = arith.mulf %3, %121 : vector<2x256xf32>
    %c59 = arith.constant 59 : index
    %c0_56 = arith.constant 0 : index
    %c0_57 = arith.constant 0 : index
    %123 = vector.load %arg2[%c59, %c0_56, %c0_57] : memref<98x1x256xf32, #tpu.memory_space<vmem>>, vector<1x1x256xf32>
    %124 = vector.shape_cast %123 : vector<1x1x256xf32> to vector<1x256xf32>
    %125 = vector.broadcast %124 : vector<1x256xf32> to vector<2x256xf32>
    %126 = arith.mulf %4, %125 : vector<2x256xf32>
    %127 = arith.addf %122, %126 : vector<2x256xf32>
    %128 = arith.addf %108, %127 : vector<2x256xf32>
    %c11 = arith.constant 11 : index
    %c0_58 = arith.constant 0 : index
    %c0_59 = arith.constant 0 : index
    %129 = vector.load %arg2[%c11, %c0_58, %c0_59] : memref<98x1x256xf32, #tpu.memory_space<vmem>>, vector<1x1x256xf32>
    %130 = vector.shape_cast %129 : vector<1x1x256xf32> to vector<1x256xf32>
    %131 = vector.broadcast %130 : vector<1x256xf32> to vector<2x256xf32>
    %132 = arith.mulf %8, %131 : vector<2x256xf32>
    %c60 = arith.constant 60 : index
    %c0_60 = arith.constant 0 : index
    %c0_61 = arith.constant 0 : index
    %133 = vector.load %arg2[%c60, %c0_60, %c0_61] : memref<98x1x256xf32, #tpu.memory_space<vmem>>, vector<1x1x256xf32>
    %134 = vector.shape_cast %133 : vector<1x1x256xf32> to vector<1x256xf32>
    %135 = vector.broadcast %134 : vector<1x256xf32> to vector<2x256xf32>
    %136 = arith.mulf %14, %135 : vector<2x256xf32>
    %137 = arith.addf %132, %136 : vector<2x256xf32>
    %138 = arith.addf %118, %137 : vector<2x256xf32>
    %c12 = arith.constant 12 : index
    %c0_62 = arith.constant 0 : index
    %c0_63 = arith.constant 0 : index
    %139 = vector.load %arg2[%c12, %c0_62, %c0_63] : memref<98x1x256xf32, #tpu.memory_space<vmem>>, vector<1x1x256xf32>
    %140 = vector.shape_cast %139 : vector<1x1x256xf32> to vector<1x256xf32>
    %141 = vector.broadcast %140 : vector<1x256xf32> to vector<2x256xf32>
    %142 = arith.mulf %9, %141 : vector<2x256xf32>
    %c61 = arith.constant 61 : index
    %c0_64 = arith.constant 0 : index
    %c0_65 = arith.constant 0 : index
    %143 = vector.load %arg2[%c61, %c0_64, %c0_65] : memref<98x1x256xf32, #tpu.memory_space<vmem>>, vector<1x1x256xf32>
    %144 = vector.shape_cast %143 : vector<1x1x256xf32> to vector<1x256xf32>
    %145 = vector.broadcast %144 : vector<1x256xf32> to vector<2x256xf32>
    %146 = arith.mulf %15, %145 : vector<2x256xf32>
    %147 = arith.addf %142, %146 : vector<2x256xf32>
    %148 = arith.addf %128, %147 : vector<2x256xf32>
    %c13 = arith.constant 13 : index
    %c0_66 = arith.constant 0 : index
    %c0_67 = arith.constant 0 : index
    %149 = vector.load %arg2[%c13, %c0_66, %c0_67] : memref<98x1x256xf32, #tpu.memory_space<vmem>>, vector<1x1x256xf32>
    %150 = vector.shape_cast %149 : vector<1x1x256xf32> to vector<1x256xf32>
    %151 = vector.broadcast %150 : vector<1x256xf32> to vector<2x256xf32>
    %152 = arith.mulf %10, %151 : vector<2x256xf32>
    %c62 = arith.constant 62 : index
    %c0_68 = arith.constant 0 : index
    %c0_69 = arith.constant 0 : index
    %153 = vector.load %arg2[%c62, %c0_68, %c0_69] : memref<98x1x256xf32, #tpu.memory_space<vmem>>, vector<1x1x256xf32>
    %154 = vector.shape_cast %153 : vector<1x1x256xf32> to vector<1x256xf32>
    %155 = vector.broadcast %154 : vector<1x256xf32> to vector<2x256xf32>
    %156 = arith.mulf %16, %155 : vector<2x256xf32>
    %157 = arith.addf %152, %156 : vector<2x256xf32>
    %158 = arith.addf %138, %157 : vector<2x256xf32>
    %159 = arith.addf %158, %148 : vector<2x256xf32>
    %c32_i32 = arith.constant 32 : i32
    %160 = tpu.dynamic_rotate %159 by %c32_i32 dim 1 : vector<2x256xf32>, i32 -> vector<2x256xf32>
    %c1_70 = arith.constant 1 : index
    %c0_71 = arith.constant 0 : index
    %c0_72 = arith.constant 0 : index
    %161 = vector.load %arg3[%c1_70, %c0_71, %c0_72] : memref<7x1x256xf32, #tpu.memory_space<vmem>>, vector<1x1x256xf32>
    %162 = vector.shape_cast %161 : vector<1x1x256xf32> to vector<1x256xf32>
    %163 = vector.broadcast %162 : vector<1x256xf32> to vector<2x256xf32>
    %164 = arith.mulf %160, %163 : vector<2x256xf32>
    %c14 = arith.constant 14 : index
    %c0_73 = arith.constant 0 : index
    %c0_74 = arith.constant 0 : index
    %165 = vector.load %arg2[%c14, %c0_73, %c0_74] : memref<98x1x256xf32, #tpu.memory_space<vmem>>, vector<1x1x256xf32>
    %166 = vector.shape_cast %165 : vector<1x1x256xf32> to vector<1x256xf32>
    %167 = vector.broadcast %166 : vector<1x256xf32> to vector<2x256xf32>
    %168 = arith.mulf %5, %167 : vector<2x256xf32>
    %c63 = arith.constant 63 : index
    %c0_75 = arith.constant 0 : index
    %c0_76 = arith.constant 0 : index
    %169 = vector.load %arg2[%c63, %c0_75, %c0_76] : memref<98x1x256xf32, #tpu.memory_space<vmem>>, vector<1x1x256xf32>
    %170 = vector.shape_cast %169 : vector<1x1x256xf32> to vector<1x256xf32>
    %171 = vector.broadcast %170 : vector<1x256xf32> to vector<2x256xf32>
    %172 = arith.mulf %11, %171 : vector<2x256xf32>
    %173 = arith.addf %168, %172 : vector<2x256xf32>
    %c15 = arith.constant 15 : index
    %c0_77 = arith.constant 0 : index
    %c0_78 = arith.constant 0 : index
    %174 = vector.load %arg2[%c15, %c0_77, %c0_78] : memref<98x1x256xf32, #tpu.memory_space<vmem>>, vector<1x1x256xf32>
    %175 = vector.shape_cast %174 : vector<1x1x256xf32> to vector<1x256xf32>
    %176 = vector.broadcast %175 : vector<1x256xf32> to vector<2x256xf32>
    %177 = arith.mulf %6, %176 : vector<2x256xf32>
    %c64 = arith.constant 64 : index
    %c0_79 = arith.constant 0 : index
    %c0_80 = arith.constant 0 : index
    %178 = vector.load %arg2[%c64, %c0_79, %c0_80] : memref<98x1x256xf32, #tpu.memory_space<vmem>>, vector<1x1x256xf32>
    %179 = vector.shape_cast %178 : vector<1x1x256xf32> to vector<1x256xf32>
    %180 = vector.broadcast %179 : vector<1x256xf32> to vector<2x256xf32>
    %181 = arith.mulf %12, %180 : vector<2x256xf32>
    %182 = arith.addf %177, %181 : vector<2x256xf32>
    %c16 = arith.constant 16 : index
    %c0_81 = arith.constant 0 : index
    %c0_82 = arith.constant 0 : index
    %183 = vector.load %arg2[%c16, %c0_81, %c0_82] : memref<98x1x256xf32, #tpu.memory_space<vmem>>, vector<1x1x256xf32>
    %184 = vector.shape_cast %183 : vector<1x1x256xf32> to vector<1x256xf32>
    %185 = vector.broadcast %184 : vector<1x256xf32> to vector<2x256xf32>
    %186 = arith.mulf %7, %185 : vector<2x256xf32>
    %c65 = arith.constant 65 : index
    %c0_83 = arith.constant 0 : index
    %c0_84 = arith.constant 0 : index
    %187 = vector.load %arg2[%c65, %c0_83, %c0_84] : memref<98x1x256xf32, #tpu.memory_space<vmem>>, vector<1x1x256xf32>
    %188 = vector.shape_cast %187 : vector<1x1x256xf32> to vector<1x256xf32>
    %189 = vector.broadcast %188 : vector<1x256xf32> to vector<2x256xf32>
    %190 = arith.mulf %13, %189 : vector<2x256xf32>
    %191 = arith.addf %186, %190 : vector<2x256xf32>
    %192 = arith.addf %173, %191 : vector<2x256xf32>
    %c17 = arith.constant 17 : index
    %c0_85 = arith.constant 0 : index
    %c0_86 = arith.constant 0 : index
    %193 = vector.load %arg2[%c17, %c0_85, %c0_86] : memref<98x1x256xf32, #tpu.memory_space<vmem>>, vector<1x1x256xf32>
    %194 = vector.shape_cast %193 : vector<1x1x256xf32> to vector<1x256xf32>
    %195 = vector.broadcast %194 : vector<1x256xf32> to vector<2x256xf32>
    %196 = arith.mulf %3, %195 : vector<2x256xf32>
    %c66 = arith.constant 66 : index
    %c0_87 = arith.constant 0 : index
    %c0_88 = arith.constant 0 : index
    %197 = vector.load %arg2[%c66, %c0_87, %c0_88] : memref<98x1x256xf32, #tpu.memory_space<vmem>>, vector<1x1x256xf32>
    %198 = vector.shape_cast %197 : vector<1x1x256xf32> to vector<1x256xf32>
    %199 = vector.broadcast %198 : vector<1x256xf32> to vector<2x256xf32>
    %200 = arith.mulf %4, %199 : vector<2x256xf32>
    %201 = arith.addf %196, %200 : vector<2x256xf32>
    %202 = arith.addf %182, %201 : vector<2x256xf32>
    %c18 = arith.constant 18 : index
    %c0_89 = arith.constant 0 : index
    %c0_90 = arith.constant 0 : index
    %203 = vector.load %arg2[%c18, %c0_89, %c0_90] : memref<98x1x256xf32, #tpu.memory_space<vmem>>, vector<1x1x256xf32>
    %204 = vector.shape_cast %203 : vector<1x1x256xf32> to vector<1x256xf32>
    %205 = vector.broadcast %204 : vector<1x256xf32> to vector<2x256xf32>
    %206 = arith.mulf %8, %205 : vector<2x256xf32>
    %c67 = arith.constant 67 : index
    %c0_91 = arith.constant 0 : index
    %c0_92 = arith.constant 0 : index
    %207 = vector.load %arg2[%c67, %c0_91, %c0_92] : memref<98x1x256xf32, #tpu.memory_space<vmem>>, vector<1x1x256xf32>
    %208 = vector.shape_cast %207 : vector<1x1x256xf32> to vector<1x256xf32>
    %209 = vector.broadcast %208 : vector<1x256xf32> to vector<2x256xf32>
    %210 = arith.mulf %14, %209 : vector<2x256xf32>
    %211 = arith.addf %206, %210 : vector<2x256xf32>
    %212 = arith.addf %192, %211 : vector<2x256xf32>
    %c19 = arith.constant 19 : index
    %c0_93 = arith.constant 0 : index
    %c0_94 = arith.constant 0 : index
    %213 = vector.load %arg2[%c19, %c0_93, %c0_94] : memref<98x1x256xf32, #tpu.memory_space<vmem>>, vector<1x1x256xf32>
    %214 = vector.shape_cast %213 : vector<1x1x256xf32> to vector<1x256xf32>
    %215 = vector.broadcast %214 : vector<1x256xf32> to vector<2x256xf32>
    %216 = arith.mulf %9, %215 : vector<2x256xf32>
    %c68 = arith.constant 68 : index
    %c0_95 = arith.constant 0 : index
    %c0_96 = arith.constant 0 : index
    %217 = vector.load %arg2[%c68, %c0_95, %c0_96] : memref<98x1x256xf32, #tpu.memory_space<vmem>>, vector<1x1x256xf32>
    %218 = vector.shape_cast %217 : vector<1x1x256xf32> to vector<1x256xf32>
    %219 = vector.broadcast %218 : vector<1x256xf32> to vector<2x256xf32>
    %220 = arith.mulf %15, %219 : vector<2x256xf32>
    %221 = arith.addf %216, %220 : vector<2x256xf32>
    %222 = arith.addf %202, %221 : vector<2x256xf32>
    %c20 = arith.constant 20 : index
    %c0_97 = arith.constant 0 : index
    %c0_98 = arith.constant 0 : index
    %223 = vector.load %arg2[%c20, %c0_97, %c0_98] : memref<98x1x256xf32, #tpu.memory_space<vmem>>, vector<1x1x256xf32>
    %224 = vector.shape_cast %223 : vector<1x1x256xf32> to vector<1x256xf32>
    %225 = vector.broadcast %224 : vector<1x256xf32> to vector<2x256xf32>
    %226 = arith.mulf %10, %225 : vector<2x256xf32>
    %c69 = arith.constant 69 : index
    %c0_99 = arith.constant 0 : index
    %c0_100 = arith.constant 0 : index
    %227 = vector.load %arg2[%c69, %c0_99, %c0_100] : memref<98x1x256xf32, #tpu.memory_space<vmem>>, vector<1x1x256xf32>
    %228 = vector.shape_cast %227 : vector<1x1x256xf32> to vector<1x256xf32>
    %229 = vector.broadcast %228 : vector<1x256xf32> to vector<2x256xf32>
    %230 = arith.mulf %16, %229 : vector<2x256xf32>
    %231 = arith.addf %226, %230 : vector<2x256xf32>
    %232 = arith.addf %212, %231 : vector<2x256xf32>
    %233 = arith.addf %232, %222 : vector<2x256xf32>
    %c16_i32 = arith.constant 16 : i32
    %234 = tpu.dynamic_rotate %233 by %c16_i32 dim 1 : vector<2x256xf32>, i32 -> vector<2x256xf32>
    %c2_101 = arith.constant 2 : index
    %c0_102 = arith.constant 0 : index
    %c0_103 = arith.constant 0 : index
    %235 = vector.load %arg3[%c2_101, %c0_102, %c0_103] : memref<7x1x256xf32, #tpu.memory_space<vmem>>, vector<1x1x256xf32>
    %236 = vector.shape_cast %235 : vector<1x1x256xf32> to vector<1x256xf32>
    %237 = vector.broadcast %236 : vector<1x256xf32> to vector<2x256xf32>
    %238 = arith.mulf %234, %237 : vector<2x256xf32>
    %239 = arith.addf %90, %238 : vector<2x256xf32>
    %c21 = arith.constant 21 : index
    %c0_104 = arith.constant 0 : index
    %c0_105 = arith.constant 0 : index
    %240 = vector.load %arg2[%c21, %c0_104, %c0_105] : memref<98x1x256xf32, #tpu.memory_space<vmem>>, vector<1x1x256xf32>
    %241 = vector.shape_cast %240 : vector<1x1x256xf32> to vector<1x256xf32>
    %242 = vector.broadcast %241 : vector<1x256xf32> to vector<2x256xf32>
    %243 = arith.mulf %5, %242 : vector<2x256xf32>
    %c70 = arith.constant 70 : index
    %c0_106 = arith.constant 0 : index
    %c0_107 = arith.constant 0 : index
    %244 = vector.load %arg2[%c70, %c0_106, %c0_107] : memref<98x1x256xf32, #tpu.memory_space<vmem>>, vector<1x1x256xf32>
    %245 = vector.shape_cast %244 : vector<1x1x256xf32> to vector<1x256xf32>
    %246 = vector.broadcast %245 : vector<1x256xf32> to vector<2x256xf32>
    %247 = arith.mulf %11, %246 : vector<2x256xf32>
    %248 = arith.addf %243, %247 : vector<2x256xf32>
    %c22 = arith.constant 22 : index
    %c0_108 = arith.constant 0 : index
    %c0_109 = arith.constant 0 : index
    %249 = vector.load %arg2[%c22, %c0_108, %c0_109] : memref<98x1x256xf32, #tpu.memory_space<vmem>>, vector<1x1x256xf32>
    %250 = vector.shape_cast %249 : vector<1x1x256xf32> to vector<1x256xf32>
    %251 = vector.broadcast %250 : vector<1x256xf32> to vector<2x256xf32>
    %252 = arith.mulf %6, %251 : vector<2x256xf32>
    %c71 = arith.constant 71 : index
    %c0_110 = arith.constant 0 : index
    %c0_111 = arith.constant 0 : index
    %253 = vector.load %arg2[%c71, %c0_110, %c0_111] : memref<98x1x256xf32, #tpu.memory_space<vmem>>, vector<1x1x256xf32>
    %254 = vector.shape_cast %253 : vector<1x1x256xf32> to vector<1x256xf32>
    %255 = vector.broadcast %254 : vector<1x256xf32> to vector<2x256xf32>
    %256 = arith.mulf %12, %255 : vector<2x256xf32>
    %257 = arith.addf %252, %256 : vector<2x256xf32>
    %c23 = arith.constant 23 : index
    %c0_112 = arith.constant 0 : index
    %c0_113 = arith.constant 0 : index
    %258 = vector.load %arg2[%c23, %c0_112, %c0_113] : memref<98x1x256xf32, #tpu.memory_space<vmem>>, vector<1x1x256xf32>
    %259 = vector.shape_cast %258 : vector<1x1x256xf32> to vector<1x256xf32>
    %260 = vector.broadcast %259 : vector<1x256xf32> to vector<2x256xf32>
    %261 = arith.mulf %7, %260 : vector<2x256xf32>
    %c72 = arith.constant 72 : index
    %c0_114 = arith.constant 0 : index
    %c0_115 = arith.constant 0 : index
    %262 = vector.load %arg2[%c72, %c0_114, %c0_115] : memref<98x1x256xf32, #tpu.memory_space<vmem>>, vector<1x1x256xf32>
    %263 = vector.shape_cast %262 : vector<1x1x256xf32> to vector<1x256xf32>
    %264 = vector.broadcast %263 : vector<1x256xf32> to vector<2x256xf32>
    %265 = arith.mulf %13, %264 : vector<2x256xf32>
    %266 = arith.addf %261, %265 : vector<2x256xf32>
    %267 = arith.addf %248, %266 : vector<2x256xf32>
    %c24 = arith.constant 24 : index
    %c0_116 = arith.constant 0 : index
    %c0_117 = arith.constant 0 : index
    %268 = vector.load %arg2[%c24, %c0_116, %c0_117] : memref<98x1x256xf32, #tpu.memory_space<vmem>>, vector<1x1x256xf32>
    %269 = vector.shape_cast %268 : vector<1x1x256xf32> to vector<1x256xf32>
    %270 = vector.broadcast %269 : vector<1x256xf32> to vector<2x256xf32>
    %271 = arith.mulf %3, %270 : vector<2x256xf32>
    %c73 = arith.constant 73 : index
    %c0_118 = arith.constant 0 : index
    %c0_119 = arith.constant 0 : index
    %272 = vector.load %arg2[%c73, %c0_118, %c0_119] : memref<98x1x256xf32, #tpu.memory_space<vmem>>, vector<1x1x256xf32>
    %273 = vector.shape_cast %272 : vector<1x1x256xf32> to vector<1x256xf32>
    %274 = vector.broadcast %273 : vector<1x256xf32> to vector<2x256xf32>
    %275 = arith.mulf %4, %274 : vector<2x256xf32>
    %276 = arith.addf %271, %275 : vector<2x256xf32>
    %277 = arith.addf %257, %276 : vector<2x256xf32>
    %c25 = arith.constant 25 : index
    %c0_120 = arith.constant 0 : index
    %c0_121 = arith.constant 0 : index
    %278 = vector.load %arg2[%c25, %c0_120, %c0_121] : memref<98x1x256xf32, #tpu.memory_space<vmem>>, vector<1x1x256xf32>
    %279 = vector.shape_cast %278 : vector<1x1x256xf32> to vector<1x256xf32>
    %280 = vector.broadcast %279 : vector<1x256xf32> to vector<2x256xf32>
    %281 = arith.mulf %8, %280 : vector<2x256xf32>
    %c74 = arith.constant 74 : index
    %c0_122 = arith.constant 0 : index
    %c0_123 = arith.constant 0 : index
    %282 = vector.load %arg2[%c74, %c0_122, %c0_123] : memref<98x1x256xf32, #tpu.memory_space<vmem>>, vector<1x1x256xf32>
    %283 = vector.shape_cast %282 : vector<1x1x256xf32> to vector<1x256xf32>
    %284 = vector.broadcast %283 : vector<1x256xf32> to vector<2x256xf32>
    %285 = arith.mulf %14, %284 : vector<2x256xf32>
    %286 = arith.addf %281, %285 : vector<2x256xf32>
    %287 = arith.addf %267, %286 : vector<2x256xf32>
    %c26 = arith.constant 26 : index
    %c0_124 = arith.constant 0 : index
    %c0_125 = arith.constant 0 : index
    %288 = vector.load %arg2[%c26, %c0_124, %c0_125] : memref<98x1x256xf32, #tpu.memory_space<vmem>>, vector<1x1x256xf32>
    %289 = vector.shape_cast %288 : vector<1x1x256xf32> to vector<1x256xf32>
    %290 = vector.broadcast %289 : vector<1x256xf32> to vector<2x256xf32>
    %291 = arith.mulf %9, %290 : vector<2x256xf32>
    %c75 = arith.constant 75 : index
    %c0_126 = arith.constant 0 : index
    %c0_127 = arith.constant 0 : index
    %292 = vector.load %arg2[%c75, %c0_126, %c0_127] : memref<98x1x256xf32, #tpu.memory_space<vmem>>, vector<1x1x256xf32>
    %293 = vector.shape_cast %292 : vector<1x1x256xf32> to vector<1x256xf32>
    %294 = vector.broadcast %293 : vector<1x256xf32> to vector<2x256xf32>
    %295 = arith.mulf %15, %294 : vector<2x256xf32>
    %296 = arith.addf %291, %295 : vector<2x256xf32>
    %297 = arith.addf %277, %296 : vector<2x256xf32>
    %c27 = arith.constant 27 : index
    %c0_128 = arith.constant 0 : index
    %c0_129 = arith.constant 0 : index
    %298 = vector.load %arg2[%c27, %c0_128, %c0_129] : memref<98x1x256xf32, #tpu.memory_space<vmem>>, vector<1x1x256xf32>
    %299 = vector.shape_cast %298 : vector<1x1x256xf32> to vector<1x256xf32>
    %300 = vector.broadcast %299 : vector<1x256xf32> to vector<2x256xf32>
    %301 = arith.mulf %10, %300 : vector<2x256xf32>
    %c76 = arith.constant 76 : index
    %c0_130 = arith.constant 0 : index
    %c0_131 = arith.constant 0 : index
    %302 = vector.load %arg2[%c76, %c0_130, %c0_131] : memref<98x1x256xf32, #tpu.memory_space<vmem>>, vector<1x1x256xf32>
    %303 = vector.shape_cast %302 : vector<1x1x256xf32> to vector<1x256xf32>
    %304 = vector.broadcast %303 : vector<1x256xf32> to vector<2x256xf32>
    %305 = arith.mulf %16, %304 : vector<2x256xf32>
    %306 = arith.addf %301, %305 : vector<2x256xf32>
    %307 = arith.addf %287, %306 : vector<2x256xf32>
    %308 = arith.addf %307, %297 : vector<2x256xf32>
    %309 = arith.addf %164, %308 : vector<2x256xf32>
    %c28 = arith.constant 28 : index
    %c0_132 = arith.constant 0 : index
    %c0_133 = arith.constant 0 : index
    %310 = vector.load %arg2[%c28, %c0_132, %c0_133] : memref<98x1x256xf32, #tpu.memory_space<vmem>>, vector<1x1x256xf32>
    %311 = vector.shape_cast %310 : vector<1x1x256xf32> to vector<1x256xf32>
    %312 = vector.broadcast %311 : vector<1x256xf32> to vector<2x256xf32>
    %313 = arith.mulf %5, %312 : vector<2x256xf32>
    %c77 = arith.constant 77 : index
    %c0_134 = arith.constant 0 : index
    %c0_135 = arith.constant 0 : index
    %314 = vector.load %arg2[%c77, %c0_134, %c0_135] : memref<98x1x256xf32, #tpu.memory_space<vmem>>, vector<1x1x256xf32>
    %315 = vector.shape_cast %314 : vector<1x1x256xf32> to vector<1x256xf32>
    %316 = vector.broadcast %315 : vector<1x256xf32> to vector<2x256xf32>
    %317 = arith.mulf %11, %316 : vector<2x256xf32>
    %318 = arith.addf %313, %317 : vector<2x256xf32>
    %c29 = arith.constant 29 : index
    %c0_136 = arith.constant 0 : index
    %c0_137 = arith.constant 0 : index
    %319 = vector.load %arg2[%c29, %c0_136, %c0_137] : memref<98x1x256xf32, #tpu.memory_space<vmem>>, vector<1x1x256xf32>
    %320 = vector.shape_cast %319 : vector<1x1x256xf32> to vector<1x256xf32>
    %321 = vector.broadcast %320 : vector<1x256xf32> to vector<2x256xf32>
    %322 = arith.mulf %6, %321 : vector<2x256xf32>
    %c78 = arith.constant 78 : index
    %c0_138 = arith.constant 0 : index
    %c0_139 = arith.constant 0 : index
    %323 = vector.load %arg2[%c78, %c0_138, %c0_139] : memref<98x1x256xf32, #tpu.memory_space<vmem>>, vector<1x1x256xf32>
    %324 = vector.shape_cast %323 : vector<1x1x256xf32> to vector<1x256xf32>
    %325 = vector.broadcast %324 : vector<1x256xf32> to vector<2x256xf32>
    %326 = arith.mulf %12, %325 : vector<2x256xf32>
    %327 = arith.addf %322, %326 : vector<2x256xf32>
    %c30 = arith.constant 30 : index
    %c0_140 = arith.constant 0 : index
    %c0_141 = arith.constant 0 : index
    %328 = vector.load %arg2[%c30, %c0_140, %c0_141] : memref<98x1x256xf32, #tpu.memory_space<vmem>>, vector<1x1x256xf32>
    %329 = vector.shape_cast %328 : vector<1x1x256xf32> to vector<1x256xf32>
    %330 = vector.broadcast %329 : vector<1x256xf32> to vector<2x256xf32>
    %331 = arith.mulf %7, %330 : vector<2x256xf32>
    %c79 = arith.constant 79 : index
    %c0_142 = arith.constant 0 : index
    %c0_143 = arith.constant 0 : index
    %332 = vector.load %arg2[%c79, %c0_142, %c0_143] : memref<98x1x256xf32, #tpu.memory_space<vmem>>, vector<1x1x256xf32>
    %333 = vector.shape_cast %332 : vector<1x1x256xf32> to vector<1x256xf32>
    %334 = vector.broadcast %333 : vector<1x256xf32> to vector<2x256xf32>
    %335 = arith.mulf %13, %334 : vector<2x256xf32>
    %336 = arith.addf %331, %335 : vector<2x256xf32>
    %337 = arith.addf %318, %336 : vector<2x256xf32>
    %c31 = arith.constant 31 : index
    %c0_144 = arith.constant 0 : index
    %c0_145 = arith.constant 0 : index
    %338 = vector.load %arg2[%c31, %c0_144, %c0_145] : memref<98x1x256xf32, #tpu.memory_space<vmem>>, vector<1x1x256xf32>
    %339 = vector.shape_cast %338 : vector<1x1x256xf32> to vector<1x256xf32>
    %340 = vector.broadcast %339 : vector<1x256xf32> to vector<2x256xf32>
    %341 = arith.mulf %3, %340 : vector<2x256xf32>
    %c80 = arith.constant 80 : index
    %c0_146 = arith.constant 0 : index
    %c0_147 = arith.constant 0 : index
    %342 = vector.load %arg2[%c80, %c0_146, %c0_147] : memref<98x1x256xf32, #tpu.memory_space<vmem>>, vector<1x1x256xf32>
    %343 = vector.shape_cast %342 : vector<1x1x256xf32> to vector<1x256xf32>
    %344 = vector.broadcast %343 : vector<1x256xf32> to vector<2x256xf32>
    %345 = arith.mulf %4, %344 : vector<2x256xf32>
    %346 = arith.addf %341, %345 : vector<2x256xf32>
    %347 = arith.addf %327, %346 : vector<2x256xf32>
    %c32 = arith.constant 32 : index
    %c0_148 = arith.constant 0 : index
    %c0_149 = arith.constant 0 : index
    %348 = vector.load %arg2[%c32, %c0_148, %c0_149] : memref<98x1x256xf32, #tpu.memory_space<vmem>>, vector<1x1x256xf32>
    %349 = vector.shape_cast %348 : vector<1x1x256xf32> to vector<1x256xf32>
    %350 = vector.broadcast %349 : vector<1x256xf32> to vector<2x256xf32>
    %351 = arith.mulf %8, %350 : vector<2x256xf32>
    %c81 = arith.constant 81 : index
    %c0_150 = arith.constant 0 : index
    %c0_151 = arith.constant 0 : index
    %352 = vector.load %arg2[%c81, %c0_150, %c0_151] : memref<98x1x256xf32, #tpu.memory_space<vmem>>, vector<1x1x256xf32>
    %353 = vector.shape_cast %352 : vector<1x1x256xf32> to vector<1x256xf32>
    %354 = vector.broadcast %353 : vector<1x256xf32> to vector<2x256xf32>
    %355 = arith.mulf %14, %354 : vector<2x256xf32>
    %356 = arith.addf %351, %355 : vector<2x256xf32>
    %357 = arith.addf %337, %356 : vector<2x256xf32>
    %c33 = arith.constant 33 : index
    %c0_152 = arith.constant 0 : index
    %c0_153 = arith.constant 0 : index
    %358 = vector.load %arg2[%c33, %c0_152, %c0_153] : memref<98x1x256xf32, #tpu.memory_space<vmem>>, vector<1x1x256xf32>
    %359 = vector.shape_cast %358 : vector<1x1x256xf32> to vector<1x256xf32>
    %360 = vector.broadcast %359 : vector<1x256xf32> to vector<2x256xf32>
    %361 = arith.mulf %9, %360 : vector<2x256xf32>
    %c82 = arith.constant 82 : index
    %c0_154 = arith.constant 0 : index
    %c0_155 = arith.constant 0 : index
    %362 = vector.load %arg2[%c82, %c0_154, %c0_155] : memref<98x1x256xf32, #tpu.memory_space<vmem>>, vector<1x1x256xf32>
    %363 = vector.shape_cast %362 : vector<1x1x256xf32> to vector<1x256xf32>
    %364 = vector.broadcast %363 : vector<1x256xf32> to vector<2x256xf32>
    %365 = arith.mulf %15, %364 : vector<2x256xf32>
    %366 = arith.addf %361, %365 : vector<2x256xf32>
    %367 = arith.addf %347, %366 : vector<2x256xf32>
    %c34 = arith.constant 34 : index
    %c0_156 = arith.constant 0 : index
    %c0_157 = arith.constant 0 : index
    %368 = vector.load %arg2[%c34, %c0_156, %c0_157] : memref<98x1x256xf32, #tpu.memory_space<vmem>>, vector<1x1x256xf32>
    %369 = vector.shape_cast %368 : vector<1x1x256xf32> to vector<1x256xf32>
    %370 = vector.broadcast %369 : vector<1x256xf32> to vector<2x256xf32>
    %371 = arith.mulf %10, %370 : vector<2x256xf32>
    %c83 = arith.constant 83 : index
    %c0_158 = arith.constant 0 : index
    %c0_159 = arith.constant 0 : index
    %372 = vector.load %arg2[%c83, %c0_158, %c0_159] : memref<98x1x256xf32, #tpu.memory_space<vmem>>, vector<1x1x256xf32>
    %373 = vector.shape_cast %372 : vector<1x1x256xf32> to vector<1x256xf32>
    %374 = vector.broadcast %373 : vector<1x256xf32> to vector<2x256xf32>
    %375 = arith.mulf %16, %374 : vector<2x256xf32>
    %376 = arith.addf %371, %375 : vector<2x256xf32>
    %377 = arith.addf %357, %376 : vector<2x256xf32>
    %378 = arith.addf %377, %367 : vector<2x256xf32>
    %c240_i32 = arith.constant 240 : i32
    %379 = tpu.dynamic_rotate %378 by %c240_i32 dim 1 : vector<2x256xf32>, i32 -> vector<2x256xf32>
    %c4_160 = arith.constant 4 : index
    %c0_161 = arith.constant 0 : index
    %c0_162 = arith.constant 0 : index
    %380 = vector.load %arg3[%c4_160, %c0_161, %c0_162] : memref<7x1x256xf32, #tpu.memory_space<vmem>>, vector<1x1x256xf32>
    %381 = vector.shape_cast %380 : vector<1x1x256xf32> to vector<1x256xf32>
    %382 = vector.broadcast %381 : vector<1x256xf32> to vector<2x256xf32>
    %383 = arith.mulf %379, %382 : vector<2x256xf32>
    %384 = arith.addf %239, %383 : vector<2x256xf32>
    %c35 = arith.constant 35 : index
    %c0_163 = arith.constant 0 : index
    %c0_164 = arith.constant 0 : index
    %385 = vector.load %arg2[%c35, %c0_163, %c0_164] : memref<98x1x256xf32, #tpu.memory_space<vmem>>, vector<1x1x256xf32>
    %386 = vector.shape_cast %385 : vector<1x1x256xf32> to vector<1x256xf32>
    %387 = vector.broadcast %386 : vector<1x256xf32> to vector<2x256xf32>
    %388 = arith.mulf %5, %387 : vector<2x256xf32>
    %c84 = arith.constant 84 : index
    %c0_165 = arith.constant 0 : index
    %c0_166 = arith.constant 0 : index
    %389 = vector.load %arg2[%c84, %c0_165, %c0_166] : memref<98x1x256xf32, #tpu.memory_space<vmem>>, vector<1x1x256xf32>
    %390 = vector.shape_cast %389 : vector<1x1x256xf32> to vector<1x256xf32>
    %391 = vector.broadcast %390 : vector<1x256xf32> to vector<2x256xf32>
    %392 = arith.mulf %11, %391 : vector<2x256xf32>
    %393 = arith.addf %388, %392 : vector<2x256xf32>
    %c36 = arith.constant 36 : index
    %c0_167 = arith.constant 0 : index
    %c0_168 = arith.constant 0 : index
    %394 = vector.load %arg2[%c36, %c0_167, %c0_168] : memref<98x1x256xf32, #tpu.memory_space<vmem>>, vector<1x1x256xf32>
    %395 = vector.shape_cast %394 : vector<1x1x256xf32> to vector<1x256xf32>
    %396 = vector.broadcast %395 : vector<1x256xf32> to vector<2x256xf32>
    %397 = arith.mulf %6, %396 : vector<2x256xf32>
    %c85 = arith.constant 85 : index
    %c0_169 = arith.constant 0 : index
    %c0_170 = arith.constant 0 : index
    %398 = vector.load %arg2[%c85, %c0_169, %c0_170] : memref<98x1x256xf32, #tpu.memory_space<vmem>>, vector<1x1x256xf32>
    %399 = vector.shape_cast %398 : vector<1x1x256xf32> to vector<1x256xf32>
    %400 = vector.broadcast %399 : vector<1x256xf32> to vector<2x256xf32>
    %401 = arith.mulf %12, %400 : vector<2x256xf32>
    %402 = arith.addf %397, %401 : vector<2x256xf32>
    %c37 = arith.constant 37 : index
    %c0_171 = arith.constant 0 : index
    %c0_172 = arith.constant 0 : index
    %403 = vector.load %arg2[%c37, %c0_171, %c0_172] : memref<98x1x256xf32, #tpu.memory_space<vmem>>, vector<1x1x256xf32>
    %404 = vector.shape_cast %403 : vector<1x1x256xf32> to vector<1x256xf32>
    %405 = vector.broadcast %404 : vector<1x256xf32> to vector<2x256xf32>
    %406 = arith.mulf %7, %405 : vector<2x256xf32>
    %c86 = arith.constant 86 : index
    %c0_173 = arith.constant 0 : index
    %c0_174 = arith.constant 0 : index
    %407 = vector.load %arg2[%c86, %c0_173, %c0_174] : memref<98x1x256xf32, #tpu.memory_space<vmem>>, vector<1x1x256xf32>
    %408 = vector.shape_cast %407 : vector<1x1x256xf32> to vector<1x256xf32>
    %409 = vector.broadcast %408 : vector<1x256xf32> to vector<2x256xf32>
    %410 = arith.mulf %13, %409 : vector<2x256xf32>
    %411 = arith.addf %406, %410 : vector<2x256xf32>
    %412 = arith.addf %393, %411 : vector<2x256xf32>
    %c38 = arith.constant 38 : index
    %c0_175 = arith.constant 0 : index
    %c0_176 = arith.constant 0 : index
    %413 = vector.load %arg2[%c38, %c0_175, %c0_176] : memref<98x1x256xf32, #tpu.memory_space<vmem>>, vector<1x1x256xf32>
    %414 = vector.shape_cast %413 : vector<1x1x256xf32> to vector<1x256xf32>
    %415 = vector.broadcast %414 : vector<1x256xf32> to vector<2x256xf32>
    %416 = arith.mulf %3, %415 : vector<2x256xf32>
    %c87 = arith.constant 87 : index
    %c0_177 = arith.constant 0 : index
    %c0_178 = arith.constant 0 : index
    %417 = vector.load %arg2[%c87, %c0_177, %c0_178] : memref<98x1x256xf32, #tpu.memory_space<vmem>>, vector<1x1x256xf32>
    %418 = vector.shape_cast %417 : vector<1x1x256xf32> to vector<1x256xf32>
    %419 = vector.broadcast %418 : vector<1x256xf32> to vector<2x256xf32>
    %420 = arith.mulf %4, %419 : vector<2x256xf32>
    %421 = arith.addf %416, %420 : vector<2x256xf32>
    %422 = arith.addf %402, %421 : vector<2x256xf32>
    %c39 = arith.constant 39 : index
    %c0_179 = arith.constant 0 : index
    %c0_180 = arith.constant 0 : index
    %423 = vector.load %arg2[%c39, %c0_179, %c0_180] : memref<98x1x256xf32, #tpu.memory_space<vmem>>, vector<1x1x256xf32>
    %424 = vector.shape_cast %423 : vector<1x1x256xf32> to vector<1x256xf32>
    %425 = vector.broadcast %424 : vector<1x256xf32> to vector<2x256xf32>
    %426 = arith.mulf %8, %425 : vector<2x256xf32>
    %c88 = arith.constant 88 : index
    %c0_181 = arith.constant 0 : index
    %c0_182 = arith.constant 0 : index
    %427 = vector.load %arg2[%c88, %c0_181, %c0_182] : memref<98x1x256xf32, #tpu.memory_space<vmem>>, vector<1x1x256xf32>
    %428 = vector.shape_cast %427 : vector<1x1x256xf32> to vector<1x256xf32>
    %429 = vector.broadcast %428 : vector<1x256xf32> to vector<2x256xf32>
    %430 = arith.mulf %14, %429 : vector<2x256xf32>
    %431 = arith.addf %426, %430 : vector<2x256xf32>
    %432 = arith.addf %412, %431 : vector<2x256xf32>
    %c40 = arith.constant 40 : index
    %c0_183 = arith.constant 0 : index
    %c0_184 = arith.constant 0 : index
    %433 = vector.load %arg2[%c40, %c0_183, %c0_184] : memref<98x1x256xf32, #tpu.memory_space<vmem>>, vector<1x1x256xf32>
    %434 = vector.shape_cast %433 : vector<1x1x256xf32> to vector<1x256xf32>
    %435 = vector.broadcast %434 : vector<1x256xf32> to vector<2x256xf32>
    %436 = arith.mulf %9, %435 : vector<2x256xf32>
    %c89 = arith.constant 89 : index
    %c0_185 = arith.constant 0 : index
    %c0_186 = arith.constant 0 : index
    %437 = vector.load %arg2[%c89, %c0_185, %c0_186] : memref<98x1x256xf32, #tpu.memory_space<vmem>>, vector<1x1x256xf32>
    %438 = vector.shape_cast %437 : vector<1x1x256xf32> to vector<1x256xf32>
    %439 = vector.broadcast %438 : vector<1x256xf32> to vector<2x256xf32>
    %440 = arith.mulf %15, %439 : vector<2x256xf32>
    %441 = arith.addf %436, %440 : vector<2x256xf32>
    %442 = arith.addf %422, %441 : vector<2x256xf32>
    %c41 = arith.constant 41 : index
    %c0_187 = arith.constant 0 : index
    %c0_188 = arith.constant 0 : index
    %443 = vector.load %arg2[%c41, %c0_187, %c0_188] : memref<98x1x256xf32, #tpu.memory_space<vmem>>, vector<1x1x256xf32>
    %444 = vector.shape_cast %443 : vector<1x1x256xf32> to vector<1x256xf32>
    %445 = vector.broadcast %444 : vector<1x256xf32> to vector<2x256xf32>
    %446 = arith.mulf %10, %445 : vector<2x256xf32>
    %c90 = arith.constant 90 : index
    %c0_189 = arith.constant 0 : index
    %c0_190 = arith.constant 0 : index
    %447 = vector.load %arg2[%c90, %c0_189, %c0_190] : memref<98x1x256xf32, #tpu.memory_space<vmem>>, vector<1x1x256xf32>
    %448 = vector.shape_cast %447 : vector<1x1x256xf32> to vector<1x256xf32>
    %449 = vector.broadcast %448 : vector<1x256xf32> to vector<2x256xf32>
    %450 = arith.mulf %16, %449 : vector<2x256xf32>
    %451 = arith.addf %446, %450 : vector<2x256xf32>
    %452 = arith.addf %432, %451 : vector<2x256xf32>
    %453 = arith.addf %452, %442 : vector<2x256xf32>
    %c224_i32 = arith.constant 224 : i32
    %454 = tpu.dynamic_rotate %453 by %c224_i32 dim 1 : vector<2x256xf32>, i32 -> vector<2x256xf32>
    %c5_191 = arith.constant 5 : index
    %c0_192 = arith.constant 0 : index
    %c0_193 = arith.constant 0 : index
    %455 = vector.load %arg3[%c5_191, %c0_192, %c0_193] : memref<7x1x256xf32, #tpu.memory_space<vmem>>, vector<1x1x256xf32>
    %456 = vector.shape_cast %455 : vector<1x1x256xf32> to vector<1x256xf32>
    %457 = vector.broadcast %456 : vector<1x256xf32> to vector<2x256xf32>
    %458 = arith.mulf %454, %457 : vector<2x256xf32>
    %459 = arith.addf %309, %458 : vector<2x256xf32>
    %c42 = arith.constant 42 : index
    %c0_194 = arith.constant 0 : index
    %c0_195 = arith.constant 0 : index
    %460 = vector.load %arg2[%c42, %c0_194, %c0_195] : memref<98x1x256xf32, #tpu.memory_space<vmem>>, vector<1x1x256xf32>
    %461 = vector.shape_cast %460 : vector<1x1x256xf32> to vector<1x256xf32>
    %462 = vector.broadcast %461 : vector<1x256xf32> to vector<2x256xf32>
    %463 = arith.mulf %5, %462 : vector<2x256xf32>
    %c91 = arith.constant 91 : index
    %c0_196 = arith.constant 0 : index
    %c0_197 = arith.constant 0 : index
    %464 = vector.load %arg2[%c91, %c0_196, %c0_197] : memref<98x1x256xf32, #tpu.memory_space<vmem>>, vector<1x1x256xf32>
    %465 = vector.shape_cast %464 : vector<1x1x256xf32> to vector<1x256xf32>
    %466 = vector.broadcast %465 : vector<1x256xf32> to vector<2x256xf32>
    %467 = arith.mulf %11, %466 : vector<2x256xf32>
    %468 = arith.addf %463, %467 : vector<2x256xf32>
    %c43 = arith.constant 43 : index
    %c0_198 = arith.constant 0 : index
    %c0_199 = arith.constant 0 : index
    %469 = vector.load %arg2[%c43, %c0_198, %c0_199] : memref<98x1x256xf32, #tpu.memory_space<vmem>>, vector<1x1x256xf32>
    %470 = vector.shape_cast %469 : vector<1x1x256xf32> to vector<1x256xf32>
    %471 = vector.broadcast %470 : vector<1x256xf32> to vector<2x256xf32>
    %472 = arith.mulf %6, %471 : vector<2x256xf32>
    %c92 = arith.constant 92 : index
    %c0_200 = arith.constant 0 : index
    %c0_201 = arith.constant 0 : index
    %473 = vector.load %arg2[%c92, %c0_200, %c0_201] : memref<98x1x256xf32, #tpu.memory_space<vmem>>, vector<1x1x256xf32>
    %474 = vector.shape_cast %473 : vector<1x1x256xf32> to vector<1x256xf32>
    %475 = vector.broadcast %474 : vector<1x256xf32> to vector<2x256xf32>
    %476 = arith.mulf %12, %475 : vector<2x256xf32>
    %477 = arith.addf %472, %476 : vector<2x256xf32>
    %c44 = arith.constant 44 : index
    %c0_202 = arith.constant 0 : index
    %c0_203 = arith.constant 0 : index
    %478 = vector.load %arg2[%c44, %c0_202, %c0_203] : memref<98x1x256xf32, #tpu.memory_space<vmem>>, vector<1x1x256xf32>
    %479 = vector.shape_cast %478 : vector<1x1x256xf32> to vector<1x256xf32>
    %480 = vector.broadcast %479 : vector<1x256xf32> to vector<2x256xf32>
    %481 = arith.mulf %7, %480 : vector<2x256xf32>
    %c93 = arith.constant 93 : index
    %c0_204 = arith.constant 0 : index
    %c0_205 = arith.constant 0 : index
    %482 = vector.load %arg2[%c93, %c0_204, %c0_205] : memref<98x1x256xf32, #tpu.memory_space<vmem>>, vector<1x1x256xf32>
    %483 = vector.shape_cast %482 : vector<1x1x256xf32> to vector<1x256xf32>
    %484 = vector.broadcast %483 : vector<1x256xf32> to vector<2x256xf32>
    %485 = arith.mulf %13, %484 : vector<2x256xf32>
    %486 = arith.addf %481, %485 : vector<2x256xf32>
    %487 = arith.addf %468, %486 : vector<2x256xf32>
    %c45 = arith.constant 45 : index
    %c0_206 = arith.constant 0 : index
    %c0_207 = arith.constant 0 : index
    %488 = vector.load %arg2[%c45, %c0_206, %c0_207] : memref<98x1x256xf32, #tpu.memory_space<vmem>>, vector<1x1x256xf32>
    %489 = vector.shape_cast %488 : vector<1x1x256xf32> to vector<1x256xf32>
    %490 = vector.broadcast %489 : vector<1x256xf32> to vector<2x256xf32>
    %491 = arith.mulf %3, %490 : vector<2x256xf32>
    %c94 = arith.constant 94 : index
    %c0_208 = arith.constant 0 : index
    %c0_209 = arith.constant 0 : index
    %492 = vector.load %arg2[%c94, %c0_208, %c0_209] : memref<98x1x256xf32, #tpu.memory_space<vmem>>, vector<1x1x256xf32>
    %493 = vector.shape_cast %492 : vector<1x1x256xf32> to vector<1x256xf32>
    %494 = vector.broadcast %493 : vector<1x256xf32> to vector<2x256xf32>
    %495 = arith.mulf %4, %494 : vector<2x256xf32>
    %496 = arith.addf %491, %495 : vector<2x256xf32>
    %497 = arith.addf %477, %496 : vector<2x256xf32>
    %c46 = arith.constant 46 : index
    %c0_210 = arith.constant 0 : index
    %c0_211 = arith.constant 0 : index
    %498 = vector.load %arg2[%c46, %c0_210, %c0_211] : memref<98x1x256xf32, #tpu.memory_space<vmem>>, vector<1x1x256xf32>
    %499 = vector.shape_cast %498 : vector<1x1x256xf32> to vector<1x256xf32>
    %500 = vector.broadcast %499 : vector<1x256xf32> to vector<2x256xf32>
    %501 = arith.mulf %8, %500 : vector<2x256xf32>
    %c95 = arith.constant 95 : index
    %c0_212 = arith.constant 0 : index
    %c0_213 = arith.constant 0 : index
    %502 = vector.load %arg2[%c95, %c0_212, %c0_213] : memref<98x1x256xf32, #tpu.memory_space<vmem>>, vector<1x1x256xf32>
    %503 = vector.shape_cast %502 : vector<1x1x256xf32> to vector<1x256xf32>
    %504 = vector.broadcast %503 : vector<1x256xf32> to vector<2x256xf32>
    %505 = arith.mulf %14, %504 : vector<2x256xf32>
    %506 = arith.addf %501, %505 : vector<2x256xf32>
    %507 = arith.addf %487, %506 : vector<2x256xf32>
    %c47 = arith.constant 47 : index
    %c0_214 = arith.constant 0 : index
    %c0_215 = arith.constant 0 : index
    %508 = vector.load %arg2[%c47, %c0_214, %c0_215] : memref<98x1x256xf32, #tpu.memory_space<vmem>>, vector<1x1x256xf32>
    %509 = vector.shape_cast %508 : vector<1x1x256xf32> to vector<1x256xf32>
    %510 = vector.broadcast %509 : vector<1x256xf32> to vector<2x256xf32>
    %511 = arith.mulf %9, %510 : vector<2x256xf32>
    %c96 = arith.constant 96 : index
    %c0_216 = arith.constant 0 : index
    %c0_217 = arith.constant 0 : index
    %512 = vector.load %arg2[%c96, %c0_216, %c0_217] : memref<98x1x256xf32, #tpu.memory_space<vmem>>, vector<1x1x256xf32>
    %513 = vector.shape_cast %512 : vector<1x1x256xf32> to vector<1x256xf32>
    %514 = vector.broadcast %513 : vector<1x256xf32> to vector<2x256xf32>
    %515 = arith.mulf %15, %514 : vector<2x256xf32>
    %516 = arith.addf %511, %515 : vector<2x256xf32>
    %517 = arith.addf %497, %516 : vector<2x256xf32>
    %c48 = arith.constant 48 : index
    %c0_218 = arith.constant 0 : index
    %c0_219 = arith.constant 0 : index
    %518 = vector.load %arg2[%c48, %c0_218, %c0_219] : memref<98x1x256xf32, #tpu.memory_space<vmem>>, vector<1x1x256xf32>
    %519 = vector.shape_cast %518 : vector<1x1x256xf32> to vector<1x256xf32>
    %520 = vector.broadcast %519 : vector<1x256xf32> to vector<2x256xf32>
    %521 = arith.mulf %10, %520 : vector<2x256xf32>
    %c97 = arith.constant 97 : index
    %c0_220 = arith.constant 0 : index
    %c0_221 = arith.constant 0 : index
    %522 = vector.load %arg2[%c97, %c0_220, %c0_221] : memref<98x1x256xf32, #tpu.memory_space<vmem>>, vector<1x1x256xf32>
    %523 = vector.shape_cast %522 : vector<1x1x256xf32> to vector<1x256xf32>
    %524 = vector.broadcast %523 : vector<1x256xf32> to vector<2x256xf32>
    %525 = arith.mulf %16, %524 : vector<2x256xf32>
    %526 = arith.addf %521, %525 : vector<2x256xf32>
    %527 = arith.addf %507, %526 : vector<2x256xf32>
    %528 = arith.addf %527, %517 : vector<2x256xf32>
    %c208_i32 = arith.constant 208 : i32
    %529 = tpu.dynamic_rotate %528 by %c208_i32 dim 1 : vector<2x256xf32>, i32 -> vector<2x256xf32>
    %c6_222 = arith.constant 6 : index
    %c0_223 = arith.constant 0 : index
    %c0_224 = arith.constant 0 : index
    %530 = vector.load %arg3[%c6_222, %c0_223, %c0_224] : memref<7x1x256xf32, #tpu.memory_space<vmem>>, vector<1x1x256xf32>
    %531 = vector.shape_cast %530 : vector<1x1x256xf32> to vector<1x256xf32>
    %532 = vector.broadcast %531 : vector<1x256xf32> to vector<2x256xf32>
    %533 = arith.mulf %529, %532 : vector<2x256xf32>
    %534 = arith.addf %384, %533 : vector<2x256xf32>
    %535 = arith.addf %534, %459 : vector<2x256xf32>
    %c0_225 = arith.constant 0 : index
    %536 = memref.load %arg1[%c0_225] : memref<1xf32, #tpu.memory_space<smem>>
    %537 = vector.broadcast %536 : f32 to vector<2x256xf32>
    %538 = arith.addf %535, %537 : vector<2x256xf32>
    %539 = arith.negf %538 : vector<2x256xf32>
    %540 = math.exp %539 : vector<2x256xf32>
    %cst_226 = arith.constant 1.000000e+00 : f32
    %541 = vector.broadcast %cst_226 : f32 to vector<2x256xf32>
    %542 = arith.addf %541, %540 : vector<2x256xf32>
    %543 = arith.divf %541, %542 : vector<2x256xf32>
    %c0_227 = arith.constant 0 : index
    %c0_228 = arith.constant 0 : index
    %544 = vector.load %arg5[%c0_227, %c0_228] : memref<2x256xf32, #tpu.memory_space<vmem>>, vector<2x256xf32>
    tpu.vector_store %arg5[%c0_227, %c0_228], %543 {strides = array<i32>} : memref<2x256xf32, #tpu.memory_space<vmem>>, vector<2x256xf32>,
    return
  }
  func.func @transform_0(%arg0: i32) -> i32 {
    %c0_i32 = arith.constant 0 : i32
    %c0_i32_0 = arith.constant 0 : i32
    return %c0_i32 : i32
  }
  func.func @transform_1(%arg0: i32) -> (i32, i32, i32) {
    %c0_i32 = arith.constant 0 : i32
    %c0_i32_0 = arith.constant 0 : i32
    %c0_i32_1 = arith.constant 0 : i32
    %c0_i32_2 = arith.constant 0 : i32
    return %c0_i32, %c0_i32_0, %c0_i32_1 : i32, i32, i32
  }
  func.func @transform_2(%arg0: i32) -> (i32, i32, i32) {
    %c0_i32 = arith.constant 0 : i32
    %c0_i32_0 = arith.constant 0 : i32
    %c0_i32_1 = arith.constant 0 : i32
    %c0_i32_2 = arith.constant 0 : i32
    return %c0_i32, %c0_i32_0, %c0_i32_1 : i32, i32, i32
  }
  func.func @transform_3(%arg0: i32) -> (i32, i32, i32) {
    %c0_i32 = arith.constant 0 : i32
    %c0_i32_0 = arith.constant 0 : i32
    %c0_i32_1 = arith.constant 0 : i32
    return %arg0, %c0_i32, %c0_i32_0 : i32, i32, i32
  }
  func.func @transform_4(%arg0: i32) -> (i32, i32) {
    %c0_i32 = arith.constant 0 : i32
    %c0_i32_0 = arith.constant 0 : i32
    return %arg0, %c0_i32 : i32, i32
  }
}

</mosaic_0001>

<bundles_post_ra>
// kernel: tpu_custom_call.1
= control target key start
LH: loop header
LB: loop body
LE: loop exit
PB: predicated region body
PF: predicated region fallthrough
CT: control target
= control target key end

     0   :  { %10 = vsyncpa [#allocation4], 0  ;;  %s4015_s0 = inlined_call_operand.<no memory space> [shape: f32[1], index: 0, kind: input, shape index: {}]   ;;  %s4016_s1 = inlined_call_operand.hbm [shape: f32[98,1,256], index: 1, kind: input, shape index: {}]   ;;  %s4017_s2 = inlined_call_operand.hbm [shape: f32[7,1,256], index: 2, kind: input, shape index: {}]   ;;  %s4018_s3 = inlined_call_operand.hbm [shape: f32[2,4,256], index: 3, kind: input, shape index: {}]   ;;  %s4019_s4 = inlined_call_operand.hbm [shape: f32[2,256], index: 4, kind: output, shape index: {}]  }
   0x1   :  { %11 = vsyncpa [#allocation7], 0 }
   0x2   :  { %12 = vsyncpa [#allocation5], 0  ;;  %s2301_s15 = smov [#allocation6]   ;;  %s2302_s17 = smov [#allocation3]  }
   0x3   :  { %s32_s16 = sshll.u32 %s2301_s15, 4  ;;  %s20_s18 = sshll.u32 %s2302_s17, 4  ;;  %s33_s16 = int_to_ptr.vmem [resolvable:$true] %s32_s16  ;;  %s2344_s18 = int_to_ptr.vmem [resolvable:$true] %s20_s18 }
   0x4   :  { %s2207_s21 = scalar_lea.hbm %s4017_s2, 224 }
   0x5   :  { %p2208_p0 = scmp.ne.s32.totalorder %s4017_s2, %s2207_s21  ;;  %p2211_p1 = scmp.lt.u32.totalorder %s2207_s21, %s4017_s2 }
   0x7   :  { %p2213_p2 = pnand %p2211_p1, %p2208_p0 }
   0x9   :  { %2216 = shalt.err (!%p2213_p2)
}
   0xa   :  { %s2217_s26 = scalar_lea.vmem %s33_s16, 224  ;;  %p2222_p4 = scmp.lt.s32.totalorder %s33_s16, %s33_s16 }
   0xb   :  { %p2218_p3 = scmp.ne.s32.totalorder %s33_s16, %s2217_s26  ;;  %p2223_p5 = scmp.lt.s32.totalorder %s2217_s26, %s2217_s26 }
   0xd   :  { %p2224_p6 = por %p2223_p5, %p2222_p4 }
   0xf   :  { %p2225_p7 = pnand %p2224_p6, %p2218_p3 }
  0x11   :  { %2228 = shalt.err (!%p2225_p7)
}
  0x12   :  { %s2303_s27 = smov 32   ;;  %s2304_s28 = smov 2  }
  0x13   :  { %38 = dma.hbm_to_vmem [thread:$0]  %s4017_s2, 224, %s33_s16, [#allocation7], %s2303_s27, %s2303_s27, %s2304_s28  }
  0x14   :  { %s2229_s7 = scalar_lea.hbm %s4016_s1, 3136 }
  0x15   :  { %p2230_p8 = scmp.ne.s32.totalorder %s4016_s1, %s2229_s7  ;;  %p2233_p9 = scmp.lt.u32.totalorder %s2229_s7, %s4016_s1 }
  0x17   :  { %p2235_p10 = pnand %p2233_p9, %p2230_p8 }
  0x19   :  { %2238 = shalt.err (!%p2235_p10)
}
  0x1a   :  { %s2239_s12 = scalar_lea.vmem %s2344_s18, 3136  ;;  %p2244_p12 = scmp.lt.s32.totalorder %s2344_s18, %s2344_s18 }
  0x1b   :  { %p2240_p11 = scmp.ne.s32.totalorder %s2344_s18, %s2239_s12  ;;  %p2245_p13 = scmp.lt.s32.totalorder %s2239_s12, %s2239_s12 }
  0x1d   :  { %p2246_p0 = por %p2245_p13, %p2244_p12 }
  0x1f   :  { %p2247_p1 = pnand %p2246_p0, %p2240_p11 }
  0x21   :  { %2250 = shalt.err (!%p2247_p1)
}
  0x22   :  { %26 = dma.hbm_to_vmem [thread:$0]  %s4016_s1, 3136, %s2344_s18, [#allocation4], %s2303_s27, %s2303_s27, %s2304_s28  }
  0x23   :  { %s2305_s14 = smov [#allocation8]   ;;  %s2251_s19 = scalar_lea.hbm %s4018_s3, 256 }
  0x24   :  { %s44_s15 = sshll.u32 %s2305_s14, 4  ;;  %p2252_p2 = scmp.ne.s32.totalorder %s4018_s3, %s2251_s19  ;;  %s45_s15 = int_to_ptr.vmem [resolvable:$true] %s44_s15 }
  0x25   :  { %p2255_p3 = scmp.lt.u32.totalorder %s2251_s19, %s4018_s3 }
  0x27   :  { %p2257_p4 = pnand %p2255_p3, %p2252_p2 }
  0x29   :  { %2260 = shalt.err (!%p2257_p4)
}
  0x2a   :  { %s2261_s24 = scalar_lea.vmem %s45_s15, 256  ;;  %p2266_p6 = scmp.lt.s32.totalorder %s45_s15, %s45_s15 }
  0x2b   :  { %p2262_p5 = scmp.ne.s32.totalorder %s45_s15, %s2261_s24  ;;  %p2267_p7 = scmp.lt.s32.totalorder %s2261_s24, %s2261_s24 }
  0x2d   :  { %p2268_p8 = por %p2267_p7, %p2266_p6 }
  0x2f   :  { %p2269_p9 = pnand %p2268_p8, %p2262_p5 }
  0x31   :  { %2272 = shalt.err (!%p2269_p9)
}
  0x32   :  { %s2306_s1 = smov 128   ;;  %s2307_s18 = smov 8  }
  0x33   :  { %50 = dma.hbm_to_vmem [thread:$0]  %s4018_s3, 256, %s45_s15, [#allocation7], %s2306_s1, %s2306_s1, %s2307_s18  }
  0x34   :  { %2295 = dma.done.wait [#allocation4], 3136  }
  0x35   :  { %2296 = vsyncadd [#allocation4], 4294964160 }
  0x36   :  { %2297 = dma.done.wait [#allocation7], 480  }
  0x37   :  { %2298 = vsyncadd [#allocation7], 4294966816  ;;  %vm68_vm0 = vcmask 1043456   ;;  %v60_v0 = vld [vmem:[#allocation8] sm:$0xff]  ;;  %v61_v1 = vld [vmem:[#allocation8 + $0x8] sm:$0xff]  ;;  %vm133_vm1 = vcmask 1041409  }
  0x38   :  { %v101_v2 = vsel %vm68_vm0, %v60_v0, -inf  ;;  %v115_v3 = vsel %vm68_vm0, %v61_v1, -inf  ;;  %v69_v4 = vsel %vm68_vm0, %v60_v0, 0.0  ;;  %v83_v5 = vsel %vm68_vm0, %v61_v1, 0.0  ;;  %s2308_s3 = smov 3   ;;  %s2309_s29 = smov 1  }
  0x39   :  { %v102_v6 = vrot.slane %v101_v2, 4  ;;  %v116_v7 = vrot.slane %v115_v3, 4  ;;  %v70_v8 = vrot.slane %v69_v4, 4  ;;  %v84_v9 = vrot.slane %v83_v5, 4  ;;  %s2310_s30 = smov 127   ;;  %s2311_s5 = smov 126  }
  0x3a   :  { %v64_v10 = vcombine.high %v60_v0, %v60_v0  ;;  %v65_v11 = vcombine.high %v61_v1, %v61_v1  ;;  %s2312_s6 = smov 125   ;;  %s2314_s7 = smov 16  }
  0x3b   :  { %v103_v12 = vmax.f32 %v101_v2, %v102_v6  ;;  %v117_v13 = vmax.f32 %v115_v3, %v116_v7  ;;  %v71_v14 = vadd.f32 %v70_v8, %v69_v4  ;;  %v85_v15 = vadd.f32 %v84_v9, %v83_v5  ;;  %v324_v6 = vld [vmem:[#allocation3 + $0x6] sm:$0x3]  ;;  %v341_v7 = vld [vmem:[#allocation3 + $0x68] sm:$0x3]  ;;  %s2316_s8 = smov 96   ;;  %s2317_s9 = smov 80  }
  0x3c   :  { %v108_v16 = vsel %vm68_vm0, %v64_v10, -inf  ;;  %v122_v17 = vsel %vm68_vm0, %v65_v11, -inf  ;;  %v76_v18 = vsel %vm68_vm0, %v64_v10, 0.0  ;;  %v90_v19 = vsel %vm68_vm0, %v65_v11, 0.0  ;;  %s2318_s12 = smov [#allocation9]  }
  0x3d   :  { %v104_v20 = vrot.slane %v103_v12, 2  ;;  %v118_v21 = vrot.slane %v117_v13, 2  ;;  %v72_v22 = vrot.slane %v71_v14, 2  ;;  %v86_v23 = vrot.slane %v85_v15, 2  ;;  %s2166_s2 = sshll.u32 %s2318_s12, 4  ;;  %s2167_s2 = int_to_ptr.vmem [resolvable:$true] %s2166_s2 }
  0x3e   :  { %v109_v24 = vrot.slane %v108_v16, 4  ;;  %v123_v25 = vrot.slane %v122_v17, 4  ;;  %v77_v26 = vrot.slane %v76_v18, 4  ;;  %v91_v27 = vrot.slane %v90_v19, 4  ;;  %p2278_p11 = scmp.lt.s32.totalorder %s2167_s2, %s2167_s2 }
  0x3f   :  { %v105_v28 = vmax.f32 %v103_v12, %v104_v20  ;;  %v119_v29 = vmax.f32 %v117_v13, %v118_v21  ;;  %v73_v30 = vadd.f32 %v72_v22, %v71_v14  ;;  %v87_v31 = vadd.f32 %v86_v23, %v85_v15  ;;  %v2439_v12 = vld [vmem:[#allocation3 + $0x8c] sm:$0x3]  ;;  %v2441_v13 = vld [vmem:[#allocation3 + $0x90] sm:$0x3]  ;;  %v2443_v14 = vld [vmem:[#allocation3 + $0x8e] sm:$0x3] }
  0x40   :  { %v110_v32 = vmax.f32 %v108_v16, %v109_v24  ;;  %v124_v33 = vmax.f32 %v122_v17, %v123_v25  ;;  %v78_v34 = vadd.f32 %v77_v26, %v76_v18  ;;  %v92_v35 = vadd.f32 %v91_v27, %v90_v19  ;;  %4162 = vst [vmem:[#allocation13_spill] sm:$0xff] %v2443_v14  ;;  %v2447_v16 = vld [vmem:[#allocation3 + $0x2e] sm:$0x3]  ;;  %v2453_v19 = vld [vmem:[#allocation3 + $0x2c] sm:$0x3] }
  0x41   :  { %v106_v36 = vrot.slane %v105_v28, 1  ;;  %v120_v37 = vrot.slane %v119_v29, 1  ;;  %v74_v38 = vrot.slane %v73_v30, 1  ;;  %v88_v39 = vrot.slane %v87_v31, 1  ;;  %4163 = vst [vmem:[#allocation14_spill] sm:$0xff] %v2447_v16  ;;  %4164 = vst [vmem:[#allocation15_spill] sm:$0xff] %v2453_v19 }
  0x42   :  { %v111_v40 = vrot.slane %v110_v32, 2  ;;  %v125_v41 = vrot.slane %v124_v33, 2  ;;  %v79_v42 = vrot.slane %v78_v34, 2  ;;  %v93_v43 = vrot.slane %v92_v35, 2  ;;  %v2455_v20 = vld [vmem:[#allocation3 + $0x62] sm:$0x3] }
  0x43   :  { %v2401_v44 = vmax.f32 %v105_v28, %v106_v36  ;;  %v2403_v45 = vmax.f32 %v119_v29, %v120_v37  ;;  %v75_v46 = vadd.f32 %v74_v38, %v73_v30  ;;  %v89_v47 = vadd.f32 %v88_v39, %v87_v31  ;;  %v2457_v21 = vld [vmem:[#allocation3 + $0x2] sm:$0x3]  ;;  %v2469_v28 = vld [vmem:[#allocation3 + $0x64] sm:$0x3]  ;;  %v2562_v38 = vld [vmem:[#allocation3 + $0x80] sm:$0x3] }
  0x44   :  { %v112_v48 = vmax.f32 %v110_v32, %v111_v40  ;;  %v126_v49 = vmax.f32 %v124_v33, %v125_v41  ;;  %v80_v50 = vadd.f32 %v79_v42, %v78_v34  ;;  %v94_v54 = vadd.f32 %v93_v43, %v92_v35  ;;  %4165 = vst [vmem:[#allocation16_spill] sm:$0xff] %v2457_v21  ;;  %v2475_v31 = vld [vmem:[#allocation3 + $0x4] sm:$0x3]  ;;  %v2477_v32 = vld [vmem:[#allocation3 + $0x66] sm:$0x3] }
  0x45   :  { %v186_v51 = vsel %vm133_vm1, %v2403_v45, %v2401_v44  ;;  %v2408_v52 = vmul.f32 0.25, %v75_v46  ;;  %v2410_v53 = vmul.f32 0.25, %v89_v47  ;;  %v142_v4 = vlaneseq  ;;  %v871_v39 = vld [vmem:[#allocation3 + $0x22] sm:$0x3]  ;;  %v888_v40 = vld [vmem:[#allocation3 + $0x84] sm:$0x3] }
  0x46   :  { %190 = vrot.lane.b32.xlu0 %v186_v51, %s2308_s3  ;;  %v113_v55 = vrot.slane %v112_v48, 1  ;;  %v127_v56 = vrot.slane %v126_v49, 1  ;;  %v81_v60 = vrot.slane %v80_v50, 1  ;;  %v95_v61 = vrot.slane %v94_v54, 1  ;;  %v2489_v41 = vld [vmem:[#allocation3 + $0x2a] sm:$0x3] }
  0x47   :  { %v134_v57 = vsel %vm133_vm1, %v2410_v53, %v2408_v52  ;;  %v229_v5 = vshrl.u32 %v142_v4, 7  ;;  %v2445_v15 = vand.u32 127, %v142_v4  ;;  %4166 = vst [vmem:[#allocation17_spill] sm:$0xff] %v2489_v41  ;;  %v2491_v42 = vld [vmem:[#allocation3] sm:$0x3] }
  0x48   :  { %154 = vrot.lane.b32.xlu1 %v134_v57, %s2309_s29  ;;  %v2415_v58 = vmax.f32 %v112_v48, %v113_v55  ;;  %v2417_v59 = vmax.f32 %v126_v49, %v127_v56  ;;  %v82_v63 = vadd.f32 %v81_v60, %v80_v50  ;;  %v96_v0 = vadd.f32 %v95_v61, %v94_v54  ;;  %v2497_v49 = vld [vmem:[#allocation3 + $0x32] sm:$0x3]  ;;  %v2507_v56 = vld [vmem:[#allocation3 + $0x8] sm:$0x3]  ;;  %v2570_v29 = vld [vmem:[#allocation3 + $0xa] sm:$0x3] }
  0x49   :  { %v2433_v8 = vsub.s32 1, %v229_v5  ;;  %v2435_v9 = vsub.s32 0, %v229_v5  ;;  %4167 = vst [vmem:[#allocation18_spill] sm:$0xff] %v2491_v42  ;;  %4168 = vst [vmem:[#allocation19_spill] sm:$0xff] %v2497_v49  ;;  %v2578_v43 = vld [vmem:[#allocation3 + $0x86] sm:$0x3] }
  0x4a   :  { %202 = vrot.lane.b32.xlu0 %v186_v51, %s2309_s29  ;;  %v187_v62 = vsel %vm133_vm1, %v2417_v59, %v2415_v58  ;;  %v2423_v1 = vmul.f32 0.25, %v82_v63  ;;  %v2425_v2 = vmul.f32 0.25, %v96_v0  ;;  %4169 = vst [vmem:[#allocation20_spill] sm:$0xff] %v2507_v56  ;;  %v2537_v63 = vld [vmem:[#allocation3 + $0x1e] sm:$0x3]  ;;  %4176 = vst [vmem:[#allocation27_spill] sm:$0xff] %v2570_v29 }
  0x4b   :  { %v333_v10 = vrot.slane %v324_v6, %v2433_v8  ;;  %v350_v11 = vrot.slane %v341_v7, %v2433_v8  ;;  %v329_v33 = vrot.slane %v324_v6, %v2435_v9  ;;  %v346_v34 = vrot.slane %v341_v7, %v2435_v9  ;;  %4172 = vst [vmem:[#allocation23_spill] sm:$0xff] %v2537_v63  ;;  %v597_v26 = vld [vmem:[#allocation3 + $0x14] sm:$0x3]  ;;  %v2633_v25 = vld [vmem:[#allocation3 + $0x28] sm:$0x3] }
  0x4c   :  { %192 = vrot.lane.b32.xlu1 %v187_v62, %s2308_s3  ;;  %v135_v3 = vsel %vm133_vm1, %v2425_v2, %v2423_v1  ;;  %v880_v61 = vrot.slane %v871_v39, %v2433_v8  ;;  %4178 = vst [vmem:[#allocation29_spill] sm:$0xff] %v2578_v43  ;;  %4185 = vst [vmem:[#allocation36_spill] sm:$0xff] %v2633_v25  ;;  %v2648_v17 = vld [vmem:[#allocation3 + $0x72] sm:$0x3]  ;;  %v2668_v18 = vld [vmem:[#allocation3 + $0x6e] sm:$0x3] }
  0x4d   :  { %v339_v22 = vmul.f32 %v333_v10, %v2425_v2  ;;  %v356_v23 = vmul.f32 %v350_v11, %v2417_v59  ;;  %v337_v46 = vmul.f32 %v333_v10, %v2423_v1  ;;  %v354_v47 = vmul.f32 %v350_v11, %v2415_v58  ;;  %v2525_v11 = vld [vmem:[#allocation3 + $0x1c] sm:$0x3]  ;;  %4189 = vst [vmem:[#allocation40_spill] sm:$0xff] %v2668_v18  ;;  %v1418_v54 = vld [vmem:[#allocation3 + $0xa0] sm:$0x3] }
  0x4e   :  { %196 = vrot.lane.b32.xlu0 %v186_v51, %s2304_s28  ;;  %v355_v60 = vmul.f32 %v346_v34, %v2403_v45  ;;  %4170 = vst [vmem:[#allocation21_spill] sm:$0xff] %v2525_v11  ;;  %v336_v0 = vmul.f32 %v329_v33, %v2408_v52  ;;  %v353_v5 = vmul.f32 %v346_v34, %v2401_v44  ;;  %v2566_v34 = vld [vmem:[#allocation3 + $0x82] sm:$0x3]  ;;  %v1694_v56 = vld [vmem:[#allocation3 + $0xae] sm:$0x3]  ;;  %vm144_vm2 = vcmp.lt.s32.totalorder %v2445_v15, 3 }
  0x4f   :  { %v360_v48 = vadd.f32 %v356_v23, %v339_v22  ;;  %v358_v7 = vadd.f32 %v354_v47, %v337_v46  ;;  %v2527_v22 = vld [vmem:[#allocation3 + $0x7e] sm:$0x3]  ;;  %v2529_v23 = vld [vmem:[#allocation3 + $0x94] sm:$0x3]  ;;  %v2539_v46 = vld [vmem:[#allocation3 + $0x6a] sm:$0x3]  ;;  %v886_v6 = vmul.f32 %v880_v61, %v2425_v2  ;;  %v884_v55 = vmul.f32 %v880_v61, %v2423_v1 }
  0x50   :  { %204 = vrot.lane.b32.xlu1 %v187_v62, %s2309_s29  ;;  %4171 = vst [vmem:[#allocation22_spill] sm:$0xff] %v2529_v23  ;;  %4173 = vst [vmem:[#allocation24_spill] sm:$0xff] %v2539_v46  ;;  %v2572_v47 = vld [vmem:[#allocation3 + $0x24] sm:$0x3]  ;;  %v2590_v61 = vld [vmem:[#allocation3 + $0xc] sm:$0x3] }
  0x51   :  { %v367_v10 = vrot.slane %v360_v48, 7  ;;  %4177 = vst [vmem:[#allocation28_spill] sm:$0xff] %v2572_v47  ;;  %4179 = vst [vmem:[#allocation30_spill] sm:$0xff] %v2590_v61  ;;  %v2727_v47 = vld [vmem:[#allocation3 + $0x3a] sm:$0x3]  ;;  %vm158_vm3 = vcmp.lt.s32.totalorder %v2445_v15, 1 }
  0x52   :  { %138 = vrot.lane.b32.xlu0 %v134_v57, %s2308_s3  ;;  %4196 = vst [vmem:[#allocation47_spill] sm:$0xff] %v2727_v47  ;;  %v2829_v47 = vld [vmem:[#allocation3 + $0xa4] sm:$0x3]  ;;  %vm151_vm4 = vcmp.lt.s32.totalorder %v2445_v15, 2  ;;  %vm165_vm5 = vcmp.lt.s32.totalorder %v2445_v15, 127  ;;  %vm172_vm6 = vcmp.lt.s32.totalorder %v2445_v15, 126 }
  0x53   :  { %4209 = vst [vmem:[#allocation60_spill] sm:$0xff] %v2829_v47  ;;  %vm179_vm7 = vcmp.lt.s32.totalorder %v2445_v15, 125  ;;  %vm481_vm8 = vcmp.lt.s32.totalorder %v2445_v15, 48  ;;  %vm1028_vm9 = vcmp.lt.s32.totalorder %v2445_v15, 16  ;;  %vm754_vm10 = vcmp.lt.s32.totalorder %v2445_v15, 32 }
  0x54   :  { %198 = vrot.lane.b32.xlu1 %v187_v62, %s2304_s28  ;;  %vm1558_vm11 = vcmp.lt.s32.totalorder %v2445_v15, 112  ;;  %vm1834_vm12 = vcmp.lt.s32.totalorder %v2445_v15, 96  ;;  %vm2110_vm13 = vcmp.lt.s32.totalorder %v2445_v15, 80 }
  0x56   :  { %147 = vrot.lane.b32.xlu0 %v134_v57, %s2304_s28 }
  0x58   :  { %156 = vrot.lane.b32.xlu1 %v135_v3, %s2309_s29 }
  0x5a   :  { %161 = vrot.lane.b32.xlu0 %v134_v57, %s2310_s30 }
  0x5c   :  { %149 = vrot.lane.b32.xlu1 %v135_v3, %s2304_s28  ;;  %s2313_s28 = smov 48  }
  0x5e   :  { %140 = vrot.lane.b32.xlu0 %v135_v3, %s2308_s3 }
  0x60   :  { %163 = vrot.lane.b32.xlu1 %v135_v3, %s2310_s30 }
  0x62   :  { %208 = vrot.lane.b32.xlu0 %v186_v51, %s2310_s30 }
  0x64   :  { %210 = vrot.lane.b32.xlu1 %v187_v62, %s2310_s30 }
  0x66   :  { %168 = vrot.lane.b32.xlu0 %v134_v57, %s2311_s5 }
  0x68   :  { %170 = vrot.lane.b32.xlu1 %v135_v3, %s2311_s5 }
  0x6a   :  { %175 = vrot.lane.b32.xlu0 %v134_v57, %s2312_s6  ;;  %v338_v57 = vmul.f32 %v329_v33, %v2410_v53  ;;  %v2564_v33 = vld [vmem:[#allocation3 + $0x20] sm:$0x3] }
  0x6b   :  { %4175 = vst [vmem:[#allocation26_spill] sm:$0xff] %v2564_v33 }
  0x6c   :  { %177 = vrot.lane.b32.xlu1 %v135_v3, %s2312_s6  ;;  %v359_v48 = vadd.f32 %v355_v60, %v338_v57  ;;  %v2558_v60 = vsel %vm133_vm1, %v367_v10, %v358_v7  ;;  %v357_v3 = vadd.f32 %v353_v5, %v336_v0  ;;  %v876_v7 = vrot.slane %v871_v39, %v2435_v9  ;;  %v2602_v5 = vld [vmem:[#allocation3 + $0x26] sm:$0x3] }
  0x6d   :  { %4174 = vst [vmem:[#allocation25_spill] sm:$0xff] %v2558_v60  ;;  %v893_v10 = vrot.slane %v888_v40, %v2435_v9  ;;  %4180 = vst [vmem:[#allocation31_spill] sm:$0xff] %v2602_v5  ;;  %v1401_v5 = vld [vmem:[#allocation3 + $0x3e] sm:$0x3]  ;;  %v1703_v60 = vrot.slane %v1694_v56, %v2433_v8 }
  0x6e   :  { %214 = vrot.lane.b32.xlu0 %v186_v51, %s2311_s5  ;;  %v365_v57 = vrot.slane %v359_v48, 7  ;;  %v606_v48 = vrot.slane %v597_v26, %v2433_v8  ;;  %v883_v30 = vmul.f32 %v876_v7, %v2408_v52 }
  0x6f   :  { %v902_v0 = vmul.f32 %v893_v10, %v2403_v45  ;;  %v900_v24 = vmul.f32 %v893_v10, %v2401_v44  ;;  %v1709_v63 = vmul.f32 %v1703_v60, %v2417_v59 }
  0x70   :  { %216 = vrot.lane.b32.xlu1 %v187_v62, %s2311_s5  ;;  %v2607_v39 = vsel %vm133_vm1, %v365_v57, %v357_v3  ;;  %v2621_v3 = vld [vmem:[#allocation3 + $0x70] sm:$0x3]  ;;  %v610_v29 = vmul.f32 %v606_v48, %v2423_v1 }
  0x71   :  { %4181 = vst [vmem:[#allocation32_spill] sm:$0xff] %v2607_v39  ;;  %v2629_v57 = vld [vmem:[#allocation3 + $0x10] sm:$0x3]  ;;  %v904_v49 = vadd.f32 %v900_v24, %v883_v30  ;;  %v2684_v30 = vld [vmem:[#allocation3 + $0x78] sm:$0x3] }
  0x72   :  { %220 = vrot.lane.b32.xlu0 %v186_v51, %s2312_s6  ;;  %4184 = vst [vmem:[#allocation35_spill] sm:$0xff] %v2629_v57  ;;  %4191 = vst [vmem:[#allocation42_spill] sm:$0xff] %v2684_v30  ;;  %v2700_v57 = vld [vmem:[#allocation3 + $0x8a] sm:$0x3]  ;;  %v1677_v30 = vld [vmem:[#allocation3 + $0x4c] sm:$0x3] }
  0x73   :  { %4192 = vst [vmem:[#allocation43_spill] sm:$0xff] %v2700_v57 }
  0x74   :  { %222 = vrot.lane.b32.xlu1 %v187_v62, %s2312_s6  ;;  %v897_v62 = vrot.slane %v888_v40, %v2433_v8  ;;  %v885_v40 = vmul.f32 %v876_v7, %v2410_v53  ;;  %v612_v7 = vmul.f32 %v606_v48, %v2425_v2  ;;  %v2721_v48 = vld [vmem:[#allocation3 + $0x9a] sm:$0x3] }
  0x76   :  { %v903_v35 = vmul.f32 %v897_v62, %v2417_v59  ;;  %v901_v50 = vmul.f32 %v897_v62, %v2415_v58  ;;  %v906_v36 = vadd.f32 %v902_v0, %v885_v40  ;;  %v2654_v0 = vld [vmem:[#allocation3 + $0x12] sm:$0x3]  ;;  %v2658_v40 = vld [vmem:[#allocation3 + $0x16] sm:$0x3] }
  0x77   :  { %4187 = vst [vmem:[#allocation38_spill] sm:$0xff] %v2654_v0  ;;  %4188 = vst [vmem:[#allocation39_spill] sm:$0xff] %v2658_v40  ;;  %v2785_v40 = vld [vmem:[#allocation3 + $0xa8] sm:$0x3] }
  0x78   :  { %v907_v4 = vadd.f32 %v903_v35, %v886_v6  ;;  %v614_v35 = vld [vmem:[#allocation3 + $0x76] sm:$0x3]  ;;  %v905_v62 = vadd.f32 %v901_v50, %v884_v55  ;;  %v2619_v6 = vld [vmem:[#allocation3 + $0xe] sm:$0x3]  ;;  %v2623_v50 = vld [vmem:[#allocation3 + $0x6c] sm:$0x3] }
  0x79   :  { %4182 = vst [vmem:[#allocation33_spill] sm:$0xff] %v2619_v6  ;;  %4183 = vst [vmem:[#allocation34_spill] sm:$0xff] %v2623_v50  ;;  %v623_v51 = vrot.slane %v614_v35, %v2433_v8  ;;  %v619_v37 = vrot.slane %v614_v35, %v2435_v9  ;;  %v912_v23 = vrot.slane %v906_v36, 7  ;;  %v2674_v35 = vld [vmem:[#allocation3 + $0x88] sm:$0x3] }
  0x7a   :  { %v914_v27 = vrot.slane %v907_v4, 7  ;;  %4190 = vst [vmem:[#allocation41_spill] sm:$0xff] %v2674_v35  ;;  %v2709_v50 = vld [vmem:[#allocation3 + $0x18] sm:$0x3]  ;;  %v2729_v36 = vld [vmem:[#allocation3 + $0x9c] sm:$0x3] }
  0x7b   :  { %v629_v10 = vmul.f32 %v623_v51, %v2417_v59  ;;  %v628_v4 = vmul.f32 %v619_v37, %v2403_v45  ;;  %v627_v24 = vmul.f32 %v623_v51, %v2415_v58  ;;  %v2703_v43 = vsel %vm133_vm1, %v912_v23, %v904_v49  ;;  %4194 = vst [vmem:[#allocation45_spill] sm:$0xff] %v2709_v50 }
  0x7c   :  { %v2640_v55 = vsel %vm133_vm1, %v914_v27, %v905_v62  ;;  %v2656_v27 = vld [vmem:[#allocation3 + $0x74] sm:$0x3]  ;;  %v602_v62 = vrot.slane %v597_v26, %v2435_v9  ;;  %4193 = vst [vmem:[#allocation44_spill] sm:$0xff] %v2703_v43  ;;  %v626_v23 = vmul.f32 %v619_v37, %v2401_v44  ;;  %v2745_v43 = vld [vmem:[#allocation3 + $0x9e] sm:$0x3]  ;;  %v1686_v50 = vrot.slane %v1677_v30, %v2433_v8 }
  0x7d   :  { %4186 = vst [vmem:[#allocation37_spill] sm:$0xff] %v2640_v55  ;;  %v633_v6 = vadd.f32 %v629_v10, %v612_v7  ;;  %v1410_v7 = vrot.slane %v1401_v5, %v2433_v8  ;;  %v1427_v10 = vrot.slane %v1418_v54, %v2433_v8  ;;  %v2719_v55 = vld [vmem:[#allocation3 + $0x38] sm:$0x3]  ;;  %v631_v51 = vadd.f32 %v627_v24, %v610_v29 }
  0x7e   :  { %v611_v26 = vmul.f32 %v602_v62, %v2410_v53  ;;  %v609_v49 = vmul.f32 %v602_v62, %v2408_v52  ;;  %4195 = vst [vmem:[#allocation46_spill] sm:$0xff] %v2719_v55  ;;  %v2735_v62 = vld [vmem:[#allocation3 + $0x1a] sm:$0x3]  ;;  %v1406_v29 = vrot.slane %v1401_v5, %v2435_v9 }
  0x7f   :  { %v640_v25 = vrot.slane %v633_v6, 7  ;;  %4197 = vst [vmem:[#allocation48_spill] sm:$0xff] %v2735_v62  ;;  %v1423_v6 = vrot.slane %v1418_v54, %v2435_v9  ;;  %v1416_v37 = vmul.f32 %v1410_v7, %v2425_v2  ;;  %v1431_v18 = vmul.f32 %v1427_v10, %v2415_v58 }
  0x80   :  { %v632_v61 = vadd.f32 %v628_v4, %v611_v26  ;;  %v2737_v26 = vld [vmem:[#allocation3 + $0x3c] sm:$0x3]  ;;  %v1433_v4 = vmul.f32 %v1427_v10, %v2417_v59  ;;  %v630_v35 = vadd.f32 %v626_v23, %v609_v49  ;;  %v2762_v49 = vld [vmem:[#allocation3 + $0x7a] sm:$0x3]  ;;  %v1415_v11 = vmul.f32 %v1406_v29, %v2410_v53  ;;  %v2799_v23 = vld [vmem:[#allocation3 + $0x48] sm:$0x3] }
  0x81   :  { %4198 = vst [vmem:[#allocation49_spill] sm:$0xff] %v2737_v26  ;;  %v2756_v24 = vsel %vm133_vm1, %v640_v25, %v631_v51  ;;  %4200 = vst [vmem:[#allocation51_spill] sm:$0xff] %v2762_v49  ;;  %v1432_v5 = vmul.f32 %v1423_v6, %v2403_v45  ;;  %v2770_v25 = vld [vmem:[#allocation3 + $0x7c] sm:$0x3]  ;;  %v1414_v51 = vmul.f32 %v1410_v7, %v2423_v1  ;;  %v2787_v7 = vld [vmem:[#allocation3 + $0xaa] sm:$0x3] }
  0x82   :  { %v638_v46 = vrot.slane %v632_v61, 7  ;;  %4199 = vst [vmem:[#allocation50_spill] sm:$0xff] %v2756_v24  ;;  %4201 = vst [vmem:[#allocation52_spill] sm:$0xff] %v2770_v25  ;;  %v1437_v54 = vadd.f32 %v1433_v4, %v1416_v37  ;;  %v2801_v61 = vld [vmem:[#allocation3 + $0x4a] sm:$0x3]  ;;  %v1413_v10 = vmul.f32 %v1406_v29, %v2408_v52  ;;  %v1430_v39 = vmul.f32 %v1423_v6, %v2401_v44 }
  0x83   :  { %4204 = vst [vmem:[#allocation55_spill] sm:$0xff] %v2799_v23  ;;  %4205 = vst [vmem:[#allocation56_spill] sm:$0xff] %v2801_v61  ;;  %v1435_v37 = vadd.f32 %v1431_v18, %v1414_v51  ;;  %v2817_v6 = vld [vmem:[#allocation3 + $0xa2] sm:$0x3]  ;;  %v2831_v24 = vld [vmem:[#allocation3 + $0x44] sm:$0x3]  ;;  %v1707_v4 = vmul.f32 %v1703_v60, %v2415_v58 }
  0x84   :  { %v2777_v57 = vsel %vm133_vm1, %v638_v46, %v630_v35  ;;  %v2793_v35 = vld [vmem:[#allocation3 + $0x40] sm:$0x3]  ;;  %v1436_v46 = vadd.f32 %v1432_v5, %v1415_v11  ;;  %v1444_v55 = vrot.slane %v1437_v54, 7  ;;  %4206 = vst [vmem:[#allocation57_spill] sm:$0xff] %v2817_v6  ;;  %v2819_v11 = vld [vmem:[#allocation3 + $0x42] sm:$0x3]  ;;  %v1434_v51 = vadd.f32 %v1430_v39, %v1413_v10 }
  0x85   :  { %4202 = vst [vmem:[#allocation53_spill] sm:$0xff] %v2777_v57  ;;  %4203 = vst [vmem:[#allocation54_spill] sm:$0xff] %v2793_v35  ;;  %v2807_v57 = vld [vmem:[#allocation3 + $0xac] sm:$0x3]  ;;  %v2821_v5 = vld [vmem:[#allocation3 + $0x46] sm:$0x3]  ;;  %v1690_v39 = vmul.f32 %v1686_v50, %v2423_v1  ;;  %v1699_v35 = vrot.slane %v1694_v56, %v2435_v9 }
  0x86   :  { %4207 = vst [vmem:[#allocation58_spill] sm:$0xff] %v2819_v11  ;;  %4208 = vst [vmem:[#allocation59_spill] sm:$0xff] %v2821_v5  ;;  %v2833_v29 = vld [vmem:[#allocation3 + $0xa6] sm:$0x3]  ;;  %v1442_v49 = vrot.slane %v1436_v46, 7  ;;  %v2844_v41 = vsel %vm133_vm1, %v1444_v55, %v1435_v37  ;;  %v1692_v37 = vmul.f32 %v1686_v50, %v2425_v2 }
  0x87   :  { %4210 = vst [vmem:[#allocation61_spill] sm:$0xff] %v2831_v24  ;;  %4211 = vst [vmem:[#allocation62_spill] sm:$0xff] %v2833_v29  ;;  %v2860_v10 = vld [vmem:[#allocation3 + $0xb6] sm:$0x3]  ;;  %v2875_v55 = vld [vmem:[#allocation3 + $0x4e] sm:$0x3]  ;;  %v1711_v18 = vadd.f32 %v1707_v4, %v1690_v39  ;;  %v1706_v62 = vmul.f32 %v1699_v35, %v2401_v44 }
  0x88   :  { %4212 = vst [vmem:[#allocation63_spill] sm:$0xff] %v2844_v41  ;;  %v2869_v54 = vsel %vm133_vm1, %v1442_v49, %v1434_v51  ;;  %4214 = vst [vmem:[#allocation65_spill] sm:$0xff] %v2875_v55  ;;  %v1682_v41 = vrot.slane %v1677_v30, %v2435_v9  ;;  %v2883_v51 = vld [vmem:[#allocation3 + $0xb8] sm:$0x3]  ;;  %v2895_v56 = vld [vmem:[#allocation3 + $0x56] sm:$0x3]  ;;  %v1713_v61 = vadd.f32 %v1709_v63, %v1692_v37 }
  0x89   :  { %4213 = vst [vmem:[#allocation64_spill] sm:$0xff] %v2869_v54  ;;  %4215 = vst [vmem:[#allocation66_spill] sm:$0xff] %v2883_v51  ;;  %v2885_v50 = vld [vmem:[#allocation3 + $0x58] sm:$0x3]  ;;  %v2897_v46 = vld [vmem:[#allocation3 + $0xba] sm:$0x3]  ;;  %v1708_v49 = vmul.f32 %v1699_v35, %v2403_v45 }
  0x8a   :  { %4216 = vst [vmem:[#allocation67_spill] sm:$0xff] %v2885_v50  ;;  %4217 = vst [vmem:[#allocation68_spill] sm:$0xff] %v2895_v56  ;;  %v1953_v54 = vld [vmem:[#allocation3 + $0x5a] sm:$0x3]  ;;  %v1970_v11 = vld [vmem:[#allocation3 + $0xbc] sm:$0x3]  ;;  %v1691_v19 = vmul.f32 %v1682_v41, %v2410_v53  ;;  %v1689_v39 = vmul.f32 %v1682_v41, %v2408_v52 }
  0x8b   :  { %v2907_v24 = vld [vmem:[#allocation3 + $0xb0] sm:$0x3]  ;;  %v2915_v60 = vld [vmem:[#allocation3 + $0xb2] sm:$0x3]  ;;  %v1962_v30 = vrot.slane %v1953_v54, %v2433_v8  ;;  %v1979_v47 = vrot.slane %v1970_v11, %v2433_v8  ;;  %v1720_v6 = vrot.slane %v1713_v61, 7  ;;  %v1958_v61 = vrot.slane %v1953_v54, %v2435_v9 }
  0x8c   :  { %4218 = vst [vmem:[#allocation69_spill] sm:$0xff] %v2907_v24  ;;  %v2913_v37 = vld [vmem:[#allocation3 + $0x50] sm:$0x3]  ;;  %4220 = vst [vmem:[#allocation71_spill] sm:$0xff] %v2915_v60  ;;  %v1164_v29 = vld [vmem:[#allocation3 + $0x92] sm:$0x3]  ;;  %v1975_v25 = vrot.slane %v1970_v11, %v2435_v9  ;;  %v1712_v63 = vadd.f32 %v1708_v49, %v1691_v19  ;;  %v1710_v51 = vadd.f32 %v1706_v62, %v1689_v39 }
  0x8d   :  { %4219 = vst [vmem:[#allocation70_spill] sm:$0xff] %v2913_v37  ;;  %v1147_v5 = vld [vmem:[#allocation3 + $0x30] sm:$0x3]  ;;  %v2931_v4 = vld [vmem:[#allocation3 + $0x52] sm:$0x3]  ;;  %v1169_v35 = vrot.slane %v1164_v29, %v2435_v9  ;;  %v1173_v0 = vrot.slane %v1164_v29, %v2433_v8  ;;  %v1968_v33 = vmul.f32 %v1962_v30, %v2425_v2  ;;  %v1985_v16 = vmul.f32 %v1979_v47, %v2417_v59 }
  0x8e   :  { %4221 = vst [vmem:[#allocation72_spill] sm:$0xff] %v2931_v4  ;;  %v2939_v26 = vld [vmem:[#allocation3 + $0xb4] sm:$0x3]  ;;  %v1152_v21 = vrot.slane %v1147_v5, %v2435_v9  ;;  %v1156_v41 = vrot.slane %v1147_v5, %v2433_v8  ;;  %v2954_v54 = vsel %vm133_vm1, %v1720_v6, %v1711_v18  ;;  %v1967_v49 = vmul.f32 %v1958_v61, %v2410_v53  ;;  %v4357_v4 = vld [vmem:[#allocation29_spill] sm:$0xff] }
  0x8f   :  { %4222 = vst [vmem:[#allocation73_spill] sm:$0xff] %v2939_v26  ;;  %v2941_v23 = vld [vmem:[#allocation3 + $0x54] sm:$0x3]  ;;  %4224 = vst [vmem:[#allocation75_spill] sm:$0xff] %v2954_v54  ;;  %v1984_v42 = vmul.f32 %v1975_v25, %v2403_v45  ;;  %v1178_v11 = vmul.f32 %v1169_v35, %v2403_v45  ;;  %v1179_v62 = vmul.f32 %v1173_v0, %v2417_v59  ;;  %v1718_v39 = vrot.slane %v1712_v63, 7 }
  0x90   :  { %4223 = vst [vmem:[#allocation74_spill] sm:$0xff] %v2941_v23  ;;  %v1161_v6 = vmul.f32 %v1152_v21, %v2410_v53  ;;  %v1162_v18 = vmul.f32 %v1156_v41, %v2425_v2  ;;  %v1966_v5 = vmul.f32 %v1962_v30, %v2423_v1  ;;  %v1983_v29 = vmul.f32 %v1979_v47, %v2415_v58  ;;  %v2983_v47 = vld [vmem:[#allocation3 + $0x5c] sm:$0x3] }
  0x91   :  { %v1989_v19 = vadd.f32 %v1985_v16, %v1968_v33  ;;  %v1965_v45 = vmul.f32 %v1958_v61, %v2408_v52  ;;  %v1982_v59 = vmul.f32 %v1975_v25, %v2401_v44  ;;  %v1988_v54 = vadd.f32 %v1984_v42, %v1967_v49  ;;  %4225 = vst [vmem:[#allocation76_spill] sm:$0xff] %v2983_v47  ;;  %v2985_v16 = vld [vmem:[#allocation3 + $0xbe] sm:$0x3] }
  0x92   :  { %v1159_v63 = vmul.f32 %v1152_v21, %v2408_v52  ;;  %v1160_v30 = vmul.f32 %v1156_v41, %v2423_v1  ;;  %4226 = vst [vmem:[#allocation77_spill] sm:$0xff] %v2985_v16  ;;  %v1176_v33 = vmul.f32 %v1169_v35, %v2401_v44  ;;  %v1177_v53 = vmul.f32 %v1173_v0, %v2415_v58  ;;  %v2997_v61 = vld [vmem:[#allocation3 + $0x5e] sm:$0x3]  ;;  %v2999_v44 = vld [vmem:[#allocation3 + $0xc0] sm:$0x3] }
  0x93   :  { %v1182_v50 = vadd.f32 %v1178_v11, %v1161_v6  ;;  %v1183_v37 = vadd.f32 %v1179_v62, %v1162_v18  ;;  %v1987_v1 = vadd.f32 %v1983_v29, %v1966_v5  ;;  %v1996_v21 = vrot.slane %v1989_v19, 7  ;;  %4228 = vst [vmem:[#allocation79_spill] sm:$0xff] %v2997_v61  ;;  %4229 = vst [vmem:[#allocation80_spill] sm:$0xff] %v2999_v44  ;;  %v3001_v58 = vld [vmem:[#allocation3 + $0x60] sm:$0x3]  ;;  %v4310_v44 = vld [vmem:[#allocation14_spill] sm:$0xff] }
  0x94   :  { %v2995_v25 = vsel %vm133_vm1, %v1718_v39, %v1710_v51  ;;  %4230 = vst [vmem:[#allocation81_spill] sm:$0xff] %v3001_v58  ;;  %v3015_v29 = vld [vmem:[#allocation3 + $0xc2] sm:$0x3]  ;;  %v1986_v19 = vadd.f32 %v1982_v59, %v1965_v45  ;;  %v1994_v49 = vrot.slane %v1988_v54, 7  ;;  %v1180_v6 = vadd.f32 %v1176_v33, %v1159_v63  ;;  %v3035_v59 = vld [vmem:[#allocation3 + $0x34] sm:$0x3] }
  0x95   :  { %4227 = vst [vmem:[#allocation78_spill] sm:$0xff] %v2995_v25  ;;  %4231 = vst [vmem:[#allocation82_spill] sm:$0xff] %v3015_v29  ;;  %v1181_v18 = vadd.f32 %v1177_v53, %v1160_v30  ;;  %v1188_v62 = vrot.slane %v1182_v50, 7  ;;  %v1190_v39 = vrot.slane %v1183_v37, 7  ;;  %v3019_v0 = vsel %vm133_vm1, %v1996_v21, %v1987_v1  ;;  %v3037_v63 = vld [vmem:[#allocation3 + $0x36] sm:$0x3] }
  0x96   :  { %4232 = vst [vmem:[#allocation83_spill] sm:$0xff] %v3019_v0  ;;  %4233 = vst [vmem:[#allocation84_spill] sm:$0xff] %v3035_v59  ;;  %v3040_v33 = vsel %vm133_vm1, %v1994_v49, %v1986_v19  ;;  %v3048_v50 = vld [vmem:[#allocation3 + $0x96] sm:$0x3]  ;;  %v3050_v53 = vld [vmem:[#allocation3 + $0x98] sm:$0x3]  ;;  %v4244_v45 = vrot.slane %v2455_v20, %v2433_v8  ;;  %v4264_v59 = vrot.slane %v2441_v13, %v2433_v8 }
  0x97   :  { %4234 = vst [vmem:[#allocation85_spill] sm:$0xff] %v3037_v63  ;;  %4235 = vst [vmem:[#allocation86_spill] sm:$0xff] %v3040_v33  ;;  %v3057_v49 = vsel %vm133_vm1, %v1188_v62, %v1180_v6  ;;  %v3060_v1 = vsel %vm133_vm1, %v1190_v39, %v1181_v18  ;;  %v4245_v18 = vrot.slane %v2455_v20, %v2435_v9  ;;  %v4305_v29 = vld [vmem:[#allocation66_spill] sm:$0xff] }
  0x98   :  { %4236 = vst [vmem:[#allocation87_spill] sm:$0xff] %v3048_v50  ;;  %4237 = vst [vmem:[#allocation88_spill] sm:$0xff] %v3050_v53  ;;  %v4246_v62 = vrot.slane %v2527_v22, %v2433_v8  ;;  %v4248_v20 = vrot.slane %v2621_v3, %v2433_v8  ;;  %v4258_v50 = vrot.slane %v2785_v40, %v2435_v9 }
  0x99   :  { %4238 = vst [vmem:[#allocation89_spill] sm:$0xff] %v3057_v49  ;;  %4239 = vst [vmem:[#allocation90_spill] sm:$0xff] %v3060_v1  ;;  %v4262_v1 = vrot.slane %v2860_v10, %v2435_v9  ;;  %v4267_v49 = vrot.slane %v2477_v32, %v2435_v9 }
  0xb8   :  { %v191_v2 = vpop.permute.xlu0 %190 }
  0xba   :  { %v3009_v11 = vpop.permute.xlu1 %154 }
  0xbc   :  { %v203_v41 = vpop.permute.xlu0 %202 }
  0xbe   :  { %v193_v30 = vpop.permute.xlu1 %192 }
  0xbf   :  { %v194_v54 = vsel %vm144_vm2, %v191_v2, %v193_v30  ;;  %v195_v19 = vsel %vm144_vm2, %v193_v30, %v191_v2  ;;  %v4240_v2 = vrot.slane %v2439_v12, %v2435_v9  ;;  %v4242_v30 = vrot.slane %v2439_v12, %v2433_v8 }
  0xc0   :  { %v197_v21 = vpop.permute.xlu0 %196  ;;  %v3094_v37 = vmul.f32 %v4245_v18, %v195_v19  ;;  %v3099_v39 = vmul.f32 %v4246_v62, %v194_v54  ;;  %v3113_v18 = vmul.f32 %v4248_v20, %v194_v54  ;;  %v4249_v62 = vrot.slane %v2621_v3, %v2435_v9 }
  0xc1   :  { %v3073_v6 = vmul.f32 %v4240_v2, %v195_v19  ;;  %v3084_v5 = vmul.f32 %v4242_v30, %v194_v54  ;;  %v3089_v2 = vmul.f32 %v4244_v45, %v194_v54  ;;  %v4247_v45 = vrot.slane %v2527_v22, %v2435_v9 }
  0xc2   :  { %v205_v51 = vpop.permute.xlu1 %204  ;;  %v3120_v35 = vmul.f32 %v4249_v62, %v195_v19  ;;  %v4252_v22 = vrot.slane %v2721_v48, %v2435_v9  ;;  %v4254_v20 = vrot.slane %v2785_v40, %v2433_v8  ;;  %v4256_v3 = vrot.slane %v2441_v13, %v2435_v9 }
  0xc3   :  { %4241 = vst [vmem:[#allocation91_spill] sm:$0xff] %v3073_v6  ;;  %4243 = vst [vmem:[#allocation92_spill] sm:$0xff] %v3084_v5  ;;  %v206_v12 = vsel %vm158_vm3, %v203_v41, %v205_v51  ;;  %v207_v30 = vsel %vm158_vm3, %v205_v51, %v203_v41  ;;  %v3108_v52 = vmul.f32 %v4247_v45, %v195_v19 }
  0xc4   :  { %v3115_v42 = vpop.permute.xlu0 %138  ;;  %v4250_v41 = vrot.slane %v2721_v48, %v2433_v8  ;;  %v3130_v45 = vmul.f32 %v4252_v22, %v195_v19  ;;  %v3135_v63 = vmul.f32 %v4254_v20, %v194_v54  ;;  %v3140_v62 = vmul.f32 %v4256_v3, %v207_v30 }
  0xc5   :  { %v4260_v48 = vrot.slane %v2860_v10, %v2433_v8  ;;  %v3155_v20 = vmul.f32 %v4262_v1, %v195_v19  ;;  %v3160_v3 = vmul.f32 %v4264_v59, %v206_v12  ;;  %v4266_v40 = vrot.slane %v2477_v32, %v2433_v8 }
  0xc6   :  { %v3125_v51 = vmul.f32 %v4250_v41, %v194_v54  ;;  %4253 = vst [vmem:[#allocation94_spill] sm:$0xff] %v3130_v45  ;;  %4255 = vst [vmem:[#allocation95_spill] sm:$0xff] %v3135_v63  ;;  %v3145_v41 = vmul.f32 %v4258_v50, %v195_v19  ;;  %v199_v53 = vpop.permute.xlu1 %198  ;;  %v4270_v59 = vrot.slane %v2566_v34, %v2435_v9 }
  0xc7   :  { %4257 = vst [vmem:[#allocation96_spill] sm:$0xff] %v3140_v62  ;;  %v3150_v22 = vmul.f32 %v4260_v48, %v194_v54  ;;  %4263 = vst [vmem:[#allocation99_spill] sm:$0xff] %v3155_v20  ;;  %v318_v50 = vmul.f32 %v4266_v40, %v206_v12  ;;  %v317_v54 = vmul.f32 %v4267_v49, %v207_v30 }
  0xc8   :  { %4251 = vst [vmem:[#allocation93_spill] sm:$0xff] %v3125_v51  ;;  %4259 = vst [vmem:[#allocation97_spill] sm:$0xff] %v3145_v41  ;;  %v4268_v48 = vrot.slane %v2566_v34, %v2433_v8  ;;  %v3173_v1 = vsel %vm151_vm4, %v197_v21, %v199_v53  ;;  %v201_v13 = vsel %vm151_vm4, %v199_v53, %v197_v21  ;;  %v148_v40 = vpop.permute.xlu0 %147 }
  0xc9   :  { %4261 = vst [vmem:[#allocation98_spill] sm:$0xff] %v3150_v22  ;;  %4265 = vst [vmem:[#allocation100_spill] sm:$0xff] %v3160_v3  ;;  %v3180_v19 = vmul.f32 %v4270_v59, %v207_v30  ;;  %v4271_v32 = vrot.slane %v2656_v27, %v2433_v8  ;;  %v4273_v53 = vrot.slane %v2745_v43, %v2433_v8  ;;  %v4325_v22 = vld [vmem:[#allocation49_spill] sm:$0xff] }
  0xca   :  { %v865_v10 = vmul.f32 %v4268_v48, %v206_v12  ;;  %4269 = vst [vmem:[#allocation101_spill] sm:$0xff] %v3173_v1  ;;  %v4272_v48 = vrot.slane %v2656_v27, %v2435_v9  ;;  %v4275_v34 = vrot.slane %v2745_v43, %v2435_v9  ;;  %v4279_v27 = vrot.slane %v2443_v14, %v2435_v9  ;;  %v157_v33 = vpop.permute.xlu1 %156 }
  0xcb   :  { %v3185_v49 = vmul.f32 %v4271_v32, %v206_v12  ;;  %v3196_v21 = vmul.f32 %v4273_v53, %v206_v12  ;;  %v4277_v32 = vrot.slane %v2807_v57, %v2433_v8  ;;  %v4281_v5 = vrot.slane %v2807_v57, %v2435_v9 }
  0xcc   :  { %v3191_v3 = vmul.f32 %v4272_v48, %v207_v30  ;;  %v3201_v59 = vmul.f32 %v4275_v34, %v207_v30  ;;  %v3211_v48 = vmul.f32 %v4279_v27, %v201_v13  ;;  %v4283_v43 = vrot.slane %v2897_v46, %v2433_v8 }
  0xcd   :  { %4274 = vst [vmem:[#allocation102_spill] sm:$0xff] %v3196_v21  ;;  %v3206_v62 = vmul.f32 %v4277_v32, %v206_v12  ;;  %v3216_v53 = vmul.f32 %v4281_v5, %v207_v30  ;;  %v4285_v6 = vrot.slane %v2897_v46, %v2435_v9  ;;  %v4287_v27 = vrot.slane %v2469_v28, %v2433_v8 }
  0xce   :  { %4276 = vst [vmem:[#allocation103_spill] sm:$0xff] %v3201_v59  ;;  %4280 = vst [vmem:[#allocation105_spill] sm:$0xff] %v3211_v48  ;;  %v3221_v34 = vmul.f32 %v4283_v43, %v206_v12  ;;  %v4288_v57 = vrot.slane %v2469_v28, %v2435_v9  ;;  %v4289_v12 = vrot.slane %v2562_v38, %v2433_v8  ;;  %v4384_v59 = vld [vmem:[#allocation45_spill] sm:$0xff] }
  0xcf   :  { %4278 = vst [vmem:[#allocation104_spill] sm:$0xff] %v3206_v62  ;;  %4282 = vst [vmem:[#allocation106_spill] sm:$0xff] %v3216_v53  ;;  %v3226_v32 = vmul.f32 %v4285_v6, %v207_v30  ;;  %v286_v48 = vmul.f32 %v4287_v27, %v3173_v1  ;;  %v4290_v46 = vrot.slane %v2562_v38, %v2435_v9 }
  0xd0   :  { %4284 = vst [vmem:[#allocation107_spill] sm:$0xff] %v3221_v34  ;;  %v285_v5 = vmul.f32 %v4288_v57, %v201_v13  ;;  %v833_v43 = vmul.f32 %v4289_v12, %v3173_v1  ;;  %v3247_v30 = vsel %vm158_vm3, %v3009_v11, %v157_v33  ;;  %v3252_v28 = vsel %vm158_vm3, %v157_v33, %v3009_v11  ;;  %v150_v34 = vpop.permute.xlu1 %149 }
  0xd1   :  { %4286 = vst [vmem:[#allocation108_spill] sm:$0xff] %v3226_v32  ;;  %v3242_v6 = vmul.f32 %v4290_v46, %v201_v13  ;;  %4291 = vst [vmem:[#allocation109_spill] sm:$0xff] %v3247_v30  ;;  %v4293_v27 = vrot.slane %v2648_v17, %v2433_v8  ;;  %v4294_v38 = vrot.slane %v2648_v17, %v2435_v9  ;;  %v162_v46 = vpop.permute.xlu0 %161 }
  0xd2   :  { %4292 = vst [vmem:[#allocation110_spill] sm:$0xff] %v3252_v28  ;;  %v4295_v14 = vrot.slane %v2475_v31, %v2433_v8  ;;  %v4296_v11 = vrot.slane %v2475_v31, %v2435_v9  ;;  %v4299_v17 = vrot.slane %v2729_v36, %v2435_v9  ;;  %v4303_v31 = vrot.slane %v2787_v7, %v2435_v9 }
  0xd3   :  { %v3258_v57 = vmul.f32 %v4293_v27, %v3173_v1  ;;  %v3263_v12 = vmul.f32 %v4294_v38, %v201_v13  ;;  %v4297_v27 = vrot.slane %v2729_v36, %v2433_v8  ;;  %v4308_v36 = vrot.slane %v4305_v29, %v2435_v9 }
  0xd4   :  { %v303_v32 = vmul.f32 %v4295_v14, %v3247_v30  ;;  %v302_v33 = vmul.f32 %v4296_v11, %v3252_v28  ;;  %v3282_v38 = vmul.f32 %v4299_v17, %v201_v13  ;;  %v4301_v14 = vrot.slane %v2787_v7, %v2433_v8 }
  0xd5   :  { %v3277_v20 = vmul.f32 %v4297_v27, %v3173_v1  ;;  %v3293_v11 = vmul.f32 %v4303_v31, %v201_v13  ;;  %v4306_v27 = vrot.slane %v4305_v29, %v2433_v8  ;;  %v3304_v17 = vmul.f32 %v4308_v36, %v201_v13 }
  0xd6   :  { %4300 = vst [vmem:[#allocation112_spill] sm:$0xff] %v3282_v38  ;;  %v3288_v0 = vmul.f32 %v4301_v14, %v3173_v1  ;;  %v4311_v14 = vrot.slane %v4310_v44, %v2435_v9  ;;  %v4313_v7 = vrot.slane %v4310_v44, %v2433_v8  ;;  %v3332_v44 = vsel %vm151_vm4, %v150_v34, %v148_v40 }
  0xd7   :  { %4298 = vst [vmem:[#allocation111_spill] sm:$0xff] %v3277_v20  ;;  %4304 = vst [vmem:[#allocation114_spill] sm:$0xff] %v3293_v11  ;;  %v3299_v58 = vmul.f32 %v4306_v27, %v3173_v1  ;;  %v4315_v27 = vld [vmem:[#allocation26_spill] sm:$0xff]  ;;  %v320_v16 = vadd.f32 %v318_v50, %v303_v32  ;;  %v4326_v50 = vrot.slane %v4325_v22, %v2433_v8 }
  0xd8   :  { %4302 = vst [vmem:[#allocation113_spill] sm:$0xff] %v3288_v0  ;;  %4309 = vst [vmem:[#allocation115_spill] sm:$0xff] %v3304_v17  ;;  %v3310_v61 = vmul.f32 %v4311_v14, %v3252_v28  ;;  %v3316_v31 = vmul.f32 %v4313_v7, %v3247_v30  ;;  %v4316_v1 = vrot.slane %v4315_v27, %v2433_v8  ;;  %v4318_v7 = vld [vmem:[#allocation38_spill] sm:$0xff]  ;;  %v4321_v17 = vld [vmem:[#allocation16_spill] sm:$0xff] }
  0xd9   :  { %4307 = vst [vmem:[#allocation66_spill] sm:$0xff] %v3299_v58  ;;  %v4317_v13 = vrot.slane %v4315_v27, %v2435_v9  ;;  %v3328_v14 = vsel %vm151_vm4, %v148_v40, %v150_v34  ;;  %v4322_v40 = vrot.slane %v4321_v17, %v2433_v8  ;;  %v319_v58 = vadd.f32 %v317_v54, %v302_v33 }
  0xda   :  { %4312 = vst [vmem:[#allocation14_spill] sm:$0xff] %v3310_v61  ;;  %4314 = vst [vmem:[#allocation116_spill] sm:$0xff] %v3316_v31  ;;  %v850_v29 = vmul.f32 %v4316_v1, %v3247_v30  ;;  %v4319_v31 = vrot.slane %v4318_v7, %v2433_v8  ;;  %v4320_v1 = vrot.slane %v4318_v7, %v2435_v9 }
  0xdb   :  { %v849_v36 = vmul.f32 %v4317_v13, %v3252_v28  ;;  %v141_v13 = vpop.permute.xlu0 %140  ;;  %v271_v34 = vmul.f32 %v4322_v40, %v3328_v14  ;;  %v3369_v32 = vmul.f32 %v4326_v50, %v3247_v30  ;;  %v4327_v54 = vrot.slane %v4325_v22, %v2435_v9  ;;  %v4329_v40 = vld [vmem:[#allocation18_spill] sm:$0xff] }
  0xdc   :  { %v3338_v61 = vmul.f32 %v4319_v31, %v3247_v30  ;;  %v3344_v27 = vmul.f32 %v4320_v1, %v3252_v28  ;;  %v4323_v31 = vrot.slane %v4321_v17, %v2435_v9  ;;  %v3358_v7 = vsel %vm144_vm2, %v3115_v42, %v141_v13  ;;  %v164_v17 = vpop.permute.xlu1 %163  ;;  %v4382_v30 = vld [vmem:[#allocation42_spill] sm:$0xff] }
  0xdd   :  { %v3363_v1 = vsel %vm144_vm2, %v141_v13, %v3115_v42  ;;  %v3375_v33 = vmul.f32 %v4327_v54, %v3252_v28  ;;  %v288_v42 = vadd.f32 %v286_v48, %v271_v34  ;;  %v4331_v13 = vld [vmem:[#allocation23_spill] sm:$0xff]  ;;  %v867_v50 = vadd.f32 %v865_v10, %v850_v29 }
  0xde   :  { %v270_v47 = vmul.f32 %v4323_v31, %v3332_v44  ;;  %4324 = vst [vmem:[#allocation26_spill] sm:$0xff] %v3363_v1  ;;  %v4330_v31 = vrot.slane %v4329_v40, %v2433_v8  ;;  %v4332_v23 = vrot.slane %v4331_v13, %v2433_v8  ;;  %v3387_v53 = vsel %vm165_vm5, %v162_v46, %v164_v17  ;;  %v4335_v34 = vld [vmem:[#allocation15_spill] sm:$0xff] }
  0xdf   :  { %4328 = vst [vmem:[#allocation38_spill] sm:$0xff] %v3375_v33  ;;  %v3391_v22 = vsel %vm165_vm5, %v164_v17, %v162_v46  ;;  %v4334_v54 = vrot.slane %v4329_v40, %v2435_v9  ;;  %v4336_v11 = vrot.slane %v4335_v34, %v2435_v9  ;;  %v209_v10 = vpop.permute.xlu0 %208  ;;  %v4338_v46 = vrot.slane %v4331_v13, %v2435_v9  ;;  %v4343_v34 = vld [vmem:[#allocation20_spill] sm:$0xff]  ;;  %v4390_v33 = vld [vmem:[#allocation34_spill] sm:$0xff] }
  0xe0   :  { %v239_v56 = vmul.f32 %v4330_v31, %v3358_v7  ;;  %v818_v25 = vmul.f32 %v4332_v23, %v3328_v14  ;;  %4333 = vst [vmem:[#allocation16_spill] sm:$0xff] %v3391_v22  ;;  %v287_v48 = vadd.f32 %v285_v5, %v270_v47  ;;  %v866_v40 = vadd.f32 %v3180_v19, %v849_v36  ;;  %v4339_v47 = vld [vmem:[#allocation17_spill] sm:$0xff]  ;;  %v211_v13 = vpop.permute.xlu1 %210 }
  0xe1   :  { %v238_v31 = vmul.f32 %v4334_v54, %v3363_v1  ;;  %v3401_v23 = vmul.f32 %v4336_v11, %v3332_v44  ;;  %v817_v17 = vmul.f32 %v4338_v46, %v3332_v44  ;;  %v4340_v5 = vrot.slane %v4339_v47, %v2435_v9  ;;  %v4342_v11 = vld [vmem:[#allocation25_spill] sm:$0xff]  ;;  %v4345_v46 = vld [vmem:[#allocation32_spill] sm:$0xff] }
  0xe2   :  { %v256_v29 = vadd.f32 %v3089_v2, %v239_v56  ;;  %v4344_v56 = vrot.slane %v4343_v34, %v2433_v8  ;;  %v3425_v28 = vadd.f32 %v4345_v46, %v287_v48  ;;  %v4346_v19 = vrot.slane %v4343_v34, %v2435_v9 }
  0xe3   :  { %4337 = vst [vmem:[#allocation49_spill] sm:$0xff] %v3401_v23  ;;  %v3414_v54 = vmul.f32 %v4340_v5, %v3363_v1  ;;  %v3417_v23 = vadd.f32 %v4342_v11, %v288_v42  ;;  %v255_v41 = vadd.f32 %v3094_v37, %v238_v31  ;;  %v4347_v5 = vld [vmem:[#allocation21_spill] sm:$0xff]  ;;  %v3441_v37 = vsel %vm165_vm5, %v211_v13, %v209_v10  ;;  %v169_v46 = vpop.permute.xlu0 %168 }
  0xe4   :  { %v387_v2 = vmul.f32 %v4344_v56, %v3391_v22  ;;  %v386_v36 = vmul.f32 %v4346_v19, %v3387_v53  ;;  %v4348_v42 = vrot.slane %v4347_v5, %v2433_v8  ;;  %v3437_v56 = vsel %vm165_vm5, %v209_v10, %v211_v13  ;;  %4349 = vst [vmem:[#allocation23_spill] sm:$0xff] %v3441_v37  ;;  %v4351_v19 = vld [vmem:[#allocation24_spill] sm:$0xff]  ;;  %v171_v60 = vpop.permute.xlu1 %170 }
  0xe5   :  { %4341 = vst [vmem:[#allocation18_spill] sm:$0xff] %v3414_v54  ;;  %v835_v54 = vadd.f32 %v833_v43, %v818_v25  ;;  %v322_v31 = vadd.f32 %v320_v16, %v256_v29  ;;  %v4350_v48 = vrot.slane %v4347_v5, %v2435_v9  ;;  %v321_v43 = vadd.f32 %v319_v58, %v255_v41  ;;  %v4354_v10 = vld [vmem:[#allocation28_spill] sm:$0xff]  ;;  %v4356_v5 = vld [vmem:[#allocation37_spill] sm:$0xff] }
  0xe6   :  { %v786_v11 = vmul.f32 %v4348_v42, %v3358_v7  ;;  %v4352_v42 = vrot.slane %v4351_v19, %v2433_v8  ;;  %v4353_v47 = vrot.slane %v4351_v19, %v2435_v9  ;;  %v4355_v16 = vrot.slane %v4354_v10, %v2433_v8 }
  0xe7   :  { %v785_v34 = vmul.f32 %v4350_v48, %v3363_v1  ;;  %v3461_v48 = vadd.f32 %v4356_v5, %v835_v54  ;;  %v834_v24 = vadd.f32 %v3242_v6, %v817_v17  ;;  %v3475_v54 = vsel %vm172_vm6, %v169_v46, %v171_v60 }
  0xe8   :  { %v402_v25 = vmul.f32 %v4352_v42, %v3441_v37  ;;  %v401_v26 = vmul.f32 %v4353_v47, %v3437_v56  ;;  %v934_v29 = vmul.f32 %v4355_v16, %v3391_v22  ;;  %v803_v13 = vadd.f32 %v3099_v39, %v786_v11 }
  0xe9   :  { %v4358_v42 = vrot.slane %v4357_v4, %v2433_v8  ;;  %v802_v41 = vadd.f32 %v3108_v52, %v785_v34  ;;  %v4359_v16 = vrot.slane %v4354_v10, %v2435_v9  ;;  %v3479_v11 = vsel %vm172_vm6, %v171_v60, %v169_v46  ;;  %v176_v34 = vpop.permute.xlu0 %175  ;;  %v4364_v60 = vld [vmem:[#allocation31_spill] sm:$0xff] }
  0xea   :  { %v404_v19 = vadd.f32 %v402_v25, %v387_v2  ;;  %v403_v47 = vadd.f32 %v401_v26, %v386_v36  ;;  %4360 = vst [vmem:[#allocation25_spill] sm:$0xff] %v3479_v11  ;;  %v869_v5 = vadd.f32 %v867_v50, %v803_v13  ;;  %v4361_v26 = vld [vmem:[#allocation27_spill] sm:$0xff]  ;;  %v4365_v50 = vrot.slane %v4364_v60, %v2433_v8 }
  0xeb   :  { %v949_v58 = vmul.f32 %v4358_v42, %v3441_v37  ;;  %v933_v39 = vmul.f32 %v4359_v16, %v3387_v53  ;;  %v4362_v6 = vrot.slane %v4361_v26, %v2433_v8  ;;  %v4363_v25 = vrot.slane %v4361_v26, %v2435_v9 }
  0xec   :  { %v3481_v2 = vadd.f32 %v404_v19, %v322_v31  ;;  %v3487_v36 = vadd.f32 %v403_v47, %v321_v43  ;;  %v968_v31 = vmul.f32 %v4365_v50, %v3479_v11  ;;  %v868_v46 = vadd.f32 %v866_v40, %v802_v41  ;;  %v4371_v40 = vld [vmem:[#allocation35_spill] sm:$0xff] }
  0xed   :  { %v951_v52 = vadd.f32 %v949_v58, %v934_v29  ;;  %v421_v17 = vmul.f32 %v4362_v6, %v3479_v11  ;;  %v420_v10 = vmul.f32 %v4363_v25, %v3475_v54  ;;  %v4366_v29 = vld [vmem:[#allocation44_spill] sm:$0xff]  ;;  %v178_v58 = vpop.permute.xlu1 %177  ;;  %v4367_v43 = vrot.slane %v4357_v4, %v2435_v9 }
  0xee   :  { %v918_v13 = vadd.f32 %v4366_v29, %v834_v24  ;;  %v4368_v47 = vrot.slane %v4364_v60, %v2435_v9  ;;  %v4372_v24 = vrot.slane %v4371_v40, %v2433_v8  ;;  %v3518_v6 = vsel %vm179_vm7, %v176_v34, %v178_v58  ;;  %v4374_v60 = vld [vmem:[#allocation39_spill] sm:$0xff] }
  0xef   :  { %v3493_v42 = vadd.f32 %v951_v52, %v869_v5  ;;  %v948_v19 = vmul.f32 %v4367_v43, %v3437_v56  ;;  %v4369_v5 = vld [vmem:[#allocation33_spill] sm:$0xff]  ;;  %v3522_v4 = vsel %vm179_vm7, %v178_v58, %v176_v34  ;;  %v593_v25 = vadd.f32 %v3185_v49, %v3338_v61  ;;  %v215_v43 = vpop.permute.xlu0 %214  ;;  %v4379_v58 = vld [vmem:[#allocation36_spill] sm:$0xff] }
  0xf0   :  { %v967_v16 = vmul.f32 %v4368_v47, %v3475_v54  ;;  %v4370_v52 = vrot.slane %v4369_v5, %v2433_v8  ;;  %v544_v41 = vmul.f32 %v4372_v24, %v3328_v14  ;;  %4373 = vst [vmem:[#allocation20_spill] sm:$0xff] %v3522_v4  ;;  %v4375_v50 = vrot.slane %v4374_v60, %v2433_v8  ;;  %v4376_v47 = vld [vmem:[#allocation30_spill] sm:$0xff] }
  0xf1   :  { %v4378_v62 = vrot.slane %v4376_v47, %v2435_v9  ;;  %v4380_v61 = vrot.slane %v4379_v58, %v2433_v8  ;;  %v950_v0 = vadd.f32 %v948_v19, %v933_v39  ;;  %v217_v38 = vpop.permute.xlu1 %216  ;;  %v4385_v39 = vrot.slane %v4384_v59, %v2433_v8 }
  0xf2   :  { %v512_v26 = vmul.f32 %v4370_v52, %v3358_v7  ;;  %v660_v29 = vmul.f32 %v4375_v50, %v3391_v22  ;;  %v4377_v52 = vrot.slane %v4376_v47, %v2433_v8  ;;  %v4381_v50 = vrot.slane %v4379_v58, %v2435_v9 }
  0xf3   :  { %v454_v34 = vmul.f32 %v4378_v62, %v3518_v6  ;;  %v1002_v49 = vmul.f32 %v4380_v61, %v3522_v4  ;;  %v4383_v47 = vrot.slane %v4382_v30, %v2433_v8  ;;  %v952_v45 = vadd.f32 %v950_v0, %v868_v46  ;;  %v4386_v61 = vld [vmem:[#allocation48_spill] sm:$0xff] }
  0xf4   :  { %v455_v24 = vmul.f32 %v4377_v52, %v3522_v4  ;;  %v1001_v63 = vmul.f32 %v4381_v50, %v3518_v6  ;;  %v529_v55 = vadd.f32 %v3113_v18, %v512_v26  ;;  %v561_v52 = vadd.f32 %v3258_v57, %v544_v41  ;;  %v4389_v41 = vld [vmem:[#allocation50_spill] sm:$0xff] }
  0xf5   :  { %v675_v62 = vmul.f32 %v4383_v47, %v3441_v37  ;;  %v694_v19 = vmul.f32 %v4385_v39, %v3479_v11  ;;  %v4387_v58 = vrot.slane %v4386_v61, %v2433_v8  ;;  %v4388_v18 = vrot.slane %v4369_v5, %v2435_v9  ;;  %v221_v39 = vpop.permute.xlu0 %220  ;;  %v223_v51 = vpop.permute.xlu1 %222 }
  0xf6   :  { %v3566_v26 = vsel %vm172_vm6, %v215_v43, %v217_v38  ;;  %v3570_v0 = vsel %vm172_vm6, %v217_v38, %v215_v43  ;;  %v595_v46 = vadd.f32 %v593_v25, %v529_v55  ;;  %v645_v47 = vadd.f32 %v4389_v41, %v561_v52  ;;  %v4396_v52 = vld [vmem:[#allocation51_spill] sm:$0xff] }
  0xf7   :  { %v728_v50 = vmul.f32 %v4387_v58, %v3522_v4  ;;  %v511_v57 = vmul.f32 %v4388_v18, %v3363_v1  ;;  %v4391_v58 = vrot.slane %v4390_v33, %v2433_v8  ;;  %v4392_v5 = vrot.slane %v4390_v33, %v2435_v9  ;;  %v4393_v1 = vld [vmem:[#allocation41_spill] sm:$0xff] }
  0xf8   :  { %v4394_v11 = vrot.slane %v4393_v1, %v2433_v8  ;;  %v4395_v55 = vrot.slane %v4393_v1, %v2435_v9  ;;  %v677_v43 = vadd.f32 %v675_v62, %v660_v29  ;;  %v4397_v41 = vrot.slane %v4396_v52, %v2433_v8 }
  0xf9   :  { %v436_v4 = vmul.f32 %v4391_v58, %v3570_v0  ;;  %v435_v18 = vmul.f32 %v4392_v5, %v3566_v26  ;;  %v528_v20 = vadd.f32 %v3120_v35, %v511_v57  ;;  %v4398_v33 = vrot.slane %v4371_v40, %v2435_v9  ;;  %v4399_v40 = vld [vmem:[#allocation40_spill] sm:$0xff] }
  0xfa   :  { %v983_v38 = vmul.f32 %v4394_v11, %v3570_v0  ;;  %v982_v25 = vmul.f32 %v4395_v55, %v3566_v26  ;;  %v709_v58 = vmul.f32 %v4397_v41, %v3570_v0  ;;  %v3600_v1 = vsel %vm179_vm7, %v221_v39, %v223_v51 }
  0xfb   :  { %v543_v5 = vmul.f32 %v4398_v33, %v3332_v44  ;;  %v438_v11 = vadd.f32 %v436_v4, %v421_v17  ;;  %v437_v37 = vadd.f32 %v435_v18, %v420_v10  ;;  %v3604_v29 = vsel %vm179_vm7, %v223_v51, %v221_v39  ;;  %v4402_v51 = vld [vmem:[#allocation43_spill] sm:$0xff] }
  0xfc   :  { %v985_v22 = vadd.f32 %v983_v38, %v968_v31  ;;  %v984_v21 = vadd.f32 %v982_v25, %v967_v16  ;;  %v679_v62 = vadd.f32 %v677_v43, %v595_v46  ;;  %v711_v35 = vadd.f32 %v709_v58, %v694_v19  ;;  %v4405_v25 = vld [vmem:[#allocation52_spill] sm:$0xff] }
  0xfd   :  { %v440_v57 = vadd.f32 %v438_v11, %v3417_v23  ;;  %v4400_v55 = vrot.slane %v4399_v40, %v2433_v8  ;;  %v439_v10 = vadd.f32 %v437_v37, %v3425_v28  ;;  %v4401_v31 = vrot.slane %v4399_v40, %v2435_v9 }
  0xfe   :  { %v987_v4 = vadd.f32 %v985_v22, %v3461_v48  ;;  %v4403_v19 = vrot.slane %v4402_v51, %v2433_v8  ;;  %v986_v23 = vadd.f32 %v984_v21, %v918_v13  ;;  %v4404_v39 = vrot.slane %v4402_v51, %v2435_v9 }
  0xff   :  { %v470_v17 = vmul.f32 %v4400_v55, %v3604_v29  ;;  %v469_v16 = vmul.f32 %v4401_v31, %v3600_v1  ;;  %v713_v37 = vadd.f32 %v711_v35, %v645_v47  ;;  %v4406_v43 = vrot.slane %v4405_v25, %v2433_v8  ;;  %v4414_v31 = vld [vmem:[#allocation46_spill] sm:$0xff] }
 0x100   :  { %v1017_v46 = vmul.f32 %v4403_v19, %v3604_v29  ;;  %v1016_v18 = vmul.f32 %v4404_v39, %v3600_v1  ;;  %v560_v58 = vadd.f32 %v3263_v12, %v543_v5  ;;  %v592_v21 = vadd.f32 %v3191_v3, %v3344_v27  ;;  %v4419_v39 = vld [vmem:[#allocation16_spill] sm:$0xff] }
 0x101   :  { %v472_v38 = vadd.f32 %v470_v17, %v455_v24  ;;  %v471_v28 = vadd.f32 %v469_v16, %v454_v34  ;;  %v743_v41 = vmul.f32 %v4406_v43, %v3604_v29  ;;  %v4407_v24 = vrot.slane %v4374_v60, %v2435_v9 }
 0x102   :  { %v1019_v22 = vadd.f32 %v1017_v46, %v1002_v49  ;;  %v1018_v48 = vadd.f32 %v1016_v18, %v1001_v63  ;;  %v594_v49 = vadd.f32 %v592_v21, %v528_v20  ;;  %v4408_v63 = vld [vmem:[#allocation53_spill] sm:$0xff]  ;;  %v4409_v3 = vrot.slane %v4382_v30, %v2435_v9  ;;  %v4420_v18 = vld [vmem:[#allocation54_spill] sm:$0xff] }
 0x103   :  { %v474_v13 = vadd.f32 %v472_v38, %v3481_v2  ;;  %v473_v33 = vadd.f32 %v471_v28, %v3487_v36  ;;  %v745_v11 = vadd.f32 %v743_v41, %v728_v50  ;;  %v659_v34 = vmul.f32 %v4407_v24, %v3387_v53  ;;  %v4428_v24 = vld [vmem:[#allocation58_spill] sm:$0xff] }
 0x104   :  { %v1021_v47 = vadd.f32 %v1019_v22, %v3493_v42  ;;  %v1020_v35 = vadd.f32 %v1018_v48, %v952_v45  ;;  %v644_v40 = vadd.f32 %v4408_v63, %v560_v58  ;;  %v674_v27 = vmul.f32 %v4409_v3, %v3437_v56  ;;  %v4425_v58 = vld [vmem:[#allocation93_spill] sm:$0xff]  ;;  %v4433_v3 = vld [vmem:[#allocation20_spill] sm:$0xff] }
 0x105   :  { %v476_v12 = vadd.f32 %v474_v13, %v440_v57  ;;  %v475_v5 = vadd.f32 %v473_v33, %v439_v10  ;;  %v747_v55 = vadd.f32 %v745_v11, %v679_v62  ;;  %v4410_v60 = vrot.slane %v4384_v59, %v2435_v9  ;;  %v4426_v13 = vld [vmem:[#allocation111_spill] sm:$0xff]  ;;  %v4427_v11 = vld [vmem:[#allocation25_spill] sm:$0xff] }
 0x106   :  { %v1023_v2 = vadd.f32 %v1021_v47, %v987_v4  ;;  %v1022_v36 = vadd.f32 %v1020_v35, %v986_v23  ;;  %v4411_v45 = vrot.slane %v4396_v52, %v2435_v9  ;;  %v676_v62 = vadd.f32 %v674_v27, %v659_v34  ;;  %v4416_v4 = vld [vmem:[#allocation47_spill] sm:$0xff]  ;;  %v4430_v35 = vld [vmem:[#allocation60_spill] sm:$0xff]  ;;  %v4434_v27 = vld [vmem:[#allocation61_spill] sm:$0xff] }
 0x107   :  { %v693_v50 = vmul.f32 %v4410_v60, %v3475_v54  ;;  %479 = vrot.lane.b32.xlu1 %v476_v12, %s2313_s28  ;;  %477 = vrot.lane.b32.xlu0 %v475_v5, %s2313_s28  ;;  %v749_v42 = vadd.f32 %v747_v55, %v713_v37  ;;  %v4412_v30 = vrot.slane %v4386_v61, %v2435_v9  ;;  %v4418_v61 = vld [vmem:[#allocation102_spill] sm:$0xff]  ;;  %v4422_v37 = vld [vmem:[#allocation23_spill] sm:$0xff] }
 0x108   :  { %v708_v20 = vmul.f32 %v4411_v45, %v3566_v26  ;;  %v4413_v59 = vrot.slane %v4405_v25, %v2435_v9  ;;  %v4415_v52 = vrot.slane %v4414_v31, %v2433_v8  ;;  %v4417_v51 = vrot.slane %v4416_v4, %v2433_v8  ;;  %v4423_v25 = vld [vmem:[#allocation57_spill] sm:$0xff]  ;;  %v4432_v5 = vld [vmem:[#allocation63_spill] sm:$0xff] }
 0x109   :  { %v727_v57 = vmul.f32 %v4412_v30, %v3518_v6  ;;  %v678_v46 = vadd.f32 %v676_v62, %v594_v49  ;;  %v1397_v23 = vadd.f32 %v4418_v61, %v3369_v32  ;;  %v4421_v38 = vrot.slane %v4420_v18, %v2433_v8  ;;  %v4438_v62 = vld [vmem:[#allocation26_spill] sm:$0xff] }
 0x10a   :  { %v710_v17 = vadd.f32 %v708_v20, %v693_v50  ;;  %v742_v10 = vmul.f32 %v4413_v59, %v3600_v1  ;;  %v1316_v16 = vmul.f32 %v4415_v52, %v3358_v7  ;;  %v1348_v19 = vmul.f32 %v4417_v51, %v3328_v14  ;;  %v4436_v50 = vld [vmem:[#allocation62_spill] sm:$0xff]  ;;  %v4442_v51 = vld [vmem:[#allocation103_spill] sm:$0xff] }
 0x10b   :  { %v1464_v28 = vmul.f32 %v4421_v38, %v4419_v39  ;;  %v4424_v43 = vrot.slane %v4423_v25, %v2433_v8  ;;  %1026 = vrot.lane.b32.xlu1 %v1023_v2, %s2314_s7  ;;  %1024 = vrot.lane.b32.xlu0 %v1022_v36, %s2314_s7  ;;  %v4429_v34 = vrot.slane %v4428_v24, %v2433_v8  ;;  %v4444_v38 = vld [vmem:[#allocation94_spill] sm:$0xff] }
 0x10c   :  { %v712_v22 = vadd.f32 %v710_v17, %v644_v40  ;;  %v744_v48 = vadd.f32 %v742_v10, %v727_v57  ;;  %v1333_v21 = vadd.f32 %v4425_v58, %v1316_v16  ;;  %v1365_v33 = vadd.f32 %v4426_v13, %v1348_v19  ;;  %v4441_v16 = vld [vmem:[#allocation38_spill] sm:$0xff] }
 0x10d   :  { %v1479_v41 = vmul.f32 %v4424_v43, %v4422_v37  ;;  %v1498_v47 = vmul.f32 %v4429_v34, %v4427_v11  ;;  %v4431_v49 = vrot.slane %v4430_v35, %v2433_v8  ;;  %v4435_v2 = vrot.slane %v4434_v27, %v2433_v8  ;;  %v4445_v43 = vld [vmem:[#allocation112_spill] sm:$0xff] }
 0x10e   :  { %v746_v40 = vadd.f32 %v744_v48, %v678_v46  ;;  %v1399_v12 = vadd.f32 %v1397_v23, %v1333_v21  ;;  %v1449_v55 = vadd.f32 %v4432_v5, %v1365_v33  ;;  %v4437_v45 = vrot.slane %v4436_v50, %v2433_v8  ;;  %v4450_v34 = vld [vmem:[#allocation64_spill] sm:$0xff]  ;;  %v4454_v5 = vld [vmem:[#allocation55_spill] sm:$0xff] }
 0x10f   :  { %v1481_v32 = vadd.f32 %v1479_v41, %v1464_v28  ;;  %v1513_v63 = vmul.f32 %v4431_v49, %v3570_v0  ;;  %v1532_v36 = vmul.f32 %v4435_v2, %v4433_v3  ;;  %v4439_v30 = vrot.slane %v4414_v31, %v2435_v9  ;;  %752 = vrot.lane.b32.xlu1 %v749_v42, %s2303_s27 }
 0x110   :  { %v1547_v20 = vmul.f32 %v4437_v45, %v3604_v29  ;;  %v4440_v17 = vrot.slane %v4416_v4, %v2435_v9  ;;  %v748_v10 = vadd.f32 %v746_v40, %v712_v22  ;;  %v1396_v19 = vadd.f32 %v4442_v51, %v4441_v16  ;;  %v4452_v40 = vld [vmem:[#allocation59_spill] sm:$0xff]  ;;  %v4457_v45 = vld [vmem:[#allocation56_spill] sm:$0xff]  ;;  %v4462_v51 = vld [vmem:[#allocation113_spill] sm:$0xff] }
 0x111   :  { %v1515_v60 = vadd.f32 %v1513_v63, %v1498_v47  ;;  %v1315_v57 = vmul.f32 %v4439_v30, %v4438_v62  ;;  %v1483_v52 = vadd.f32 %v1481_v32, %v1399_v12  ;;  %v4443_v46 = vrot.slane %v4420_v18, %v2435_v9  ;;  %v4459_v30 = vld [vmem:[#allocation65_spill] sm:$0xff] }
 0x112   :  { %v1347_v59 = vmul.f32 %v4440_v17, %v3332_v44  ;;  %v1549_v31 = vadd.f32 %v1547_v20, %v1532_v36  ;;  %750 = vrot.lane.b32.xlu0 %v748_v10, %s2303_s27  ;;  %v4446_v4 = vrot.slane %v4423_v25, %v2435_v9  ;;  %v4447_v18 = vrot.slane %v4428_v24, %v2435_v9  ;;  %s2315_s27 = smov 112  }
 0x113   :  { %v1463_v61 = vmul.f32 %v4443_v46, %v3387_v53  ;;  %v1517_v23 = vadd.f32 %v1515_v60, %v1449_v55  ;;  %v1332_v28 = vadd.f32 %v4444_v38, %v1315_v57  ;;  %v4448_v42 = vrot.slane %v4430_v35, %v2435_v9  ;;  %v4456_v60 = vld [vmem:[#allocation109_spill] sm:$0xff]  ;;  %v4463_v46 = vld [vmem:[#allocation104_spill] sm:$0xff] }
 0x114   :  { %v1364_v41 = vadd.f32 %v4445_v43, %v1347_v59  ;;  %v1478_v22 = vmul.f32 %v4446_v4, %v3437_v56  ;;  %v1497_v48 = vmul.f32 %v4447_v18, %v3475_v54  ;;  %v4449_v21 = vrot.slane %v4434_v27, %v2435_v9  ;;  %v4468_v4 = vld [vmem:[#allocation71_spill] sm:$0xff] }
 0x115   :  { %v1512_v58 = vmul.f32 %v4448_v42, %v3566_v26  ;;  %v1551_v33 = vadd.f32 %v1549_v31, %v1483_v52  ;;  %v1398_v32 = vadd.f32 %v1396_v19, %v1332_v28  ;;  %v4451_v47 = vrot.slane %v4436_v50, %v2435_v9  ;;  %v4461_v52 = vld [vmem:[#allocation95_spill] sm:$0xff]  ;;  %v4466_v28 = vld [vmem:[#allocation70_spill] sm:$0xff] }
 0x116   :  { %v1531_v13 = vmul.f32 %v4449_v21, %v3518_v6  ;;  %v1448_v25 = vadd.f32 %v4450_v34, %v1364_v41  ;;  %v1480_v49 = vadd.f32 %v1478_v22, %v1463_v61  ;;  %v4453_v35 = vrot.slane %v4452_v40, %v2433_v8  ;;  %v4470_v42 = vld [vmem:[#allocation75_spill] sm:$0xff]  ;;  %v4471_v21 = vld [vmem:[#allocation72_spill] sm:$0xff] }
 0x117   :  { %v1546_v24 = vmul.f32 %v4451_v47, %v3600_v1  ;;  %v1514_v63 = vadd.f32 %v1512_v58, %v1497_v48  ;;  %v4455_v55 = vrot.slane %v4454_v5, %v2433_v8  ;;  %v1553_v2 = vadd.f32 %v1551_v33, %v1517_v23  ;;  %v4464_v23 = vld [vmem:[#allocation69_spill] sm:$0xff] }
 0x118   :  { %v1592_v12 = vmul.f32 %v4453_v35, %v3358_v7  ;;  %v4458_v20 = vrot.slane %v4457_v45, %v2433_v8  ;;  %v4460_v57 = vrot.slane %v4459_v30, %v2433_v8  ;;  %v1482_v59 = vadd.f32 %v1480_v49, %v1398_v32  ;;  %v4473_v32 = vld [vmem:[#allocation73_spill] sm:$0xff] }
 0x119   :  { %v1624_v27 = vmul.f32 %v4455_v55, %v3328_v14  ;;  %v1548_v36 = vadd.f32 %v1546_v24, %v1531_v13  ;;  %v1516_v10 = vadd.f32 %v1514_v63, %v1448_v25  ;;  %1556 = vrot.lane.b32.xlu1 %v1553_v2, %s2315_s27  ;;  %v4465_v31 = vrot.slane %v4464_v23, %v2433_v8 }
 0x11a   :  { %v1656_v50 = vmul.f32 %v4458_v20, %v4456_v60  ;;  %v1740_v17 = vmul.f32 %v4460_v57, %v4419_v39  ;;  %v1609_v16 = vadd.f32 %v4461_v52, %v1592_v12  ;;  %v4467_v43 = vrot.slane %v4466_v28, %v2433_v8 }
 0x11b   :  { %v1641_v19 = vadd.f32 %v4462_v51, %v1624_v27  ;;  %v1755_v38 = vmul.f32 %v4465_v31, %v4422_v37  ;;  %v4469_v22 = vrot.slane %v4468_v4, %v2433_v8  ;;  %v1550_v48 = vadd.f32 %v1548_v36, %v1482_v59  ;;  %v4477_v36 = vld [vmem:[#allocation110_spill] sm:$0xff]  ;;  %v4479_v59 = vld [vmem:[#allocation97_spill] sm:$0xff] }
 0x11c   :  { %v1673_v61 = vadd.f32 %v4463_v46, %v1656_v50  ;;  %v1774_v41 = vmul.f32 %v4467_v43, %v4427_v11  ;;  %v4472_v13 = vrot.slane %v4471_v21, %v2433_v8  ;;  %v4474_v34 = vrot.slane %v4473_v32, %v2433_v8 }
 0x11d   :  { %v1789_v18 = vmul.f32 %v4469_v22, %v3570_v0  ;;  %v1725_v58 = vadd.f32 %v4470_v42, %v1641_v19  ;;  %v1757_v24 = vadd.f32 %v1755_v38, %v1740_v17  ;;  %v4475_v63 = vrot.slane %v4452_v40, %v2435_v9  ;;  %v4482_v19 = vld [vmem:[#allocation106_spill] sm:$0xff] }
 0x11e   :  { %v1808_v33 = vmul.f32 %v4472_v13, %v4433_v3  ;;  %v1823_v25 = vmul.f32 %v4474_v34, %v3604_v29  ;;  %v1675_v47 = vadd.f32 %v1673_v61, %v1609_v16  ;;  %v1552_v12 = vadd.f32 %v1550_v48, %v1516_v10  ;;  %v4481_v16 = vld [vmem:[#allocation114_spill] sm:$0xff] }
 0x11f   :  { %v1791_v49 = vadd.f32 %v1789_v18, %v1774_v41  ;;  %v1591_v35 = vmul.f32 %v4475_v63, %v4438_v62  ;;  %v4476_v27 = vrot.slane %v4454_v5, %v2435_v9  ;;  %v4478_v20 = vrot.slane %v4457_v45, %v2435_v9  ;;  %v4488_v42 = vld [vmem:[#allocation78_spill] sm:$0xff] }
 0x120   :  { %v1825_v55 = vadd.f32 %v1823_v25, %v1808_v33  ;;  %v1759_v57 = vadd.f32 %v1757_v24, %v1675_v47  ;;  %v4480_v40 = vrot.slane %v4459_v30, %v2435_v9  ;;  %1554 = vrot.lane.b32.xlu0 %v1552_v12, %s2315_s27  ;;  %v4483_v46 = vrot.slane %v4464_v23, %v2435_v9  ;;  %v4489_v13 = vld [vmem:[#allocation74_spill] sm:$0xff] }
 0x121   :  { %v1623_v2 = vmul.f32 %v4476_v27, %v3332_v44  ;;  %v1655_v50 = vmul.f32 %v4478_v20, %v4477_v36  ;;  %v1793_v17 = vadd.f32 %v1791_v49, %v1725_v58  ;;  %v1608_v52 = vadd.f32 %v4479_v59, %v1591_v35 }
 0x122   :  { %v1739_v10 = vmul.f32 %v4480_v40, %v3387_v53  ;;  %v1754_v45 = vmul.f32 %v4483_v46, %v3437_v56  ;;  %v4484_v61 = vrot.slane %v4466_v28, %v2435_v9  ;;  %v1827_v38 = vadd.f32 %v1825_v55, %v1759_v57  ;;  %v4495_v55 = vld [vmem:[#allocation98_spill] sm:$0xff] }
 0x123   :  { %v1640_v51 = vadd.f32 %v4481_v16, %v1623_v2  ;;  %v1672_v5 = vadd.f32 %v4482_v19, %v1655_v50  ;;  %v4485_v30 = vrot.slane %v4468_v4, %v2435_v9  ;;  %v4486_v41 = vrot.slane %v4471_v21, %v2435_v9  ;;  %v4491_v21 = vld [vmem:[#allocation68_spill] sm:$0xff]  ;;  %v4496_v2 = vld [vmem:[#allocation67_spill] sm:$0xff] }
 0x124   :  { %v1773_v31 = vmul.f32 %v4484_v61, %v3475_v54  ;;  %v4487_v23 = vrot.slane %v4473_v32, %v2435_v9  ;;  %v1756_v58 = vadd.f32 %v1754_v45, %v1739_v10  ;;  %v4490_v33 = vrot.slane %v4489_v13, %v2433_v8  ;;  %v4493_v32 = vld [vmem:[#allocation17_spill] sm:$0xff] }
 0x125   :  { %v1788_v43 = vmul.f32 %v4485_v30, %v3566_v26  ;;  %v1807_v22 = vmul.f32 %v4486_v41, %v3518_v6  ;;  %v1674_v48 = vadd.f32 %v1672_v5, %v1608_v52  ;;  %v1724_v28 = vadd.f32 %v4488_v42, %v1640_v51  ;;  %v4499_v52 = vld [vmem:[#allocation76_spill] sm:$0xff]  ;;  %v4503_v5 = vld [vmem:[#allocation107_spill] sm:$0xff]  ;;  %v4508_v41 = vld [vmem:[#allocation81_spill] sm:$0xff] }
 0x126   :  { %v1822_v18 = vmul.f32 %v4487_v23, %v3600_v1  ;;  %v1868_v4 = vmul.f32 %v4490_v33, %v3358_v7  ;;  %v1829_v34 = vadd.f32 %v1827_v38, %v1793_v17  ;;  %v4492_v24 = vrot.slane %v4491_v21, %v2433_v8  ;;  %v4498_v17 = vld [vmem:[#allocation66_spill] sm:$0xff] }
 0x127   :  { %v1790_v25 = vadd.f32 %v1788_v43, %v1773_v31  ;;  %v4494_v63 = vrot.slane %v4493_v32, %v2433_v8  ;;  %v1758_v12 = vadd.f32 %v1756_v58, %v1674_v48  ;;  %v4497_v20 = vrot.slane %v4496_v2, %v2433_v8  ;;  %v4506_v31 = vld [vmem:[#allocation80_spill] sm:$0xff] }
 0x128   :  { %v1824_v47 = vadd.f32 %v1822_v18, %v1807_v22  ;;  %v1900_v49 = vmul.f32 %v4492_v24, %v3328_v14  ;;  %v1885_v27 = vadd.f32 %v4495_v55, %v1868_v4  ;;  %1832 = vrot.lane.b32.xlu1 %v1829_v34, %s2316_s8  ;;  %v4500_v40 = vrot.slane %v4499_v52, %v2433_v8  ;;  %v4510_v18 = vld [vmem:[#allocation82_spill] sm:$0xff]  ;;  %v4514_v24 = vld [vmem:[#allocation83_spill] sm:$0xff] }
 0x129   :  { %v1062_v35 = vmul.f32 %v4494_v63, %v3358_v7  ;;  %v1932_v50 = vmul.f32 %v4497_v20, %v4456_v60  ;;  %v1792_v57 = vadd.f32 %v1790_v25, %v1724_v28  ;;  %v4501_v7 = vld [vmem:[#allocation77_spill] sm:$0xff]  ;;  %v4504_v60 = vld [vmem:[#allocation79_spill] sm:$0xff]  ;;  %v4507_v38 = vrot.slane %v4506_v31, %v2433_v8 }
 0x12a   :  { %v1917_v59 = vadd.f32 %v4498_v17, %v1900_v49  ;;  %v2016_v10 = vmul.f32 %v4500_v40, %v4419_v39  ;;  %v4502_v16 = vrot.slane %v4501_v7, %v2433_v8  ;;  %v1826_v19 = vadd.f32 %v1824_v47, %v1758_v12  ;;  %v4515_v63 = vld [vmem:[#allocation99_spill] sm:$0xff] }
 0x12b   :  { %v1949_v46 = vadd.f32 %v4503_v5, %v1932_v50  ;;  %v4505_v45 = vrot.slane %v4504_v60, %v2433_v8  ;;  %v2065_v30 = vmul.f32 %v4507_v38, %v3570_v0  ;;  %v4509_v22 = vrot.slane %v4508_v41, %v2433_v8 }
 0x12c   :  { %v2031_v51 = vmul.f32 %v4502_v16, %v4422_v37  ;;  %v4511_v48 = vrot.slane %v4510_v18, %v2433_v8  ;;  %v4512_v28 = vrot.slane %v4489_v13, %v2435_v9  ;;  %v1828_v33 = vadd.f32 %v1826_v19, %v1792_v57  ;;  %v4517_v13 = vld [vmem:[#allocation115_spill] sm:$0xff] }
 0x12d   :  { %v2050_v61 = vmul.f32 %v4505_v45, %v4427_v11  ;;  %v2084_v23 = vmul.f32 %v4509_v22, %v4433_v3  ;;  %v1951_v4 = vadd.f32 %v1949_v46, %v1885_v27  ;;  %v4513_v25 = vrot.slane %v4491_v21, %v2435_v9 }
 0x12e   :  { %v2033_v43 = vadd.f32 %v2031_v51, %v2016_v10  ;;  %v2099_v42 = vmul.f32 %v4511_v48, %v3604_v29  ;;  %v1867_v58 = vmul.f32 %v4512_v28, %v4438_v62  ;;  %v2001_v49 = vadd.f32 %v4514_v24, %v1917_v59  ;;  %1830 = vrot.lane.b32.xlu0 %v1828_v33, %s2316_s8  ;;  %v4520_v59 = vld [vmem:[#allocation108_spill] sm:$0xff]  ;;  %v4532_v33 = vld [vmem:[#allocation13_spill] sm:$0xff] }
 0x12f   :  { %v2067_v34 = vadd.f32 %v2065_v30, %v2050_v61  ;;  %v1899_v47 = vmul.f32 %v4513_v25, %v3332_v44  ;;  %v4516_v55 = vrot.slane %v4496_v2, %v2435_v9  ;;  %v4518_v50 = vrot.slane %v4499_v52, %v2435_v9 }
 0x130   :  { %v2101_v32 = vadd.f32 %v2099_v42, %v2084_v23  ;;  %v1884_v12 = vadd.f32 %v4515_v63, %v1867_v58  ;;  %v2035_v62 = vadd.f32 %v2033_v43, %v1951_v4  ;;  %v4519_v44 = vrot.slane %v4501_v7, %v2435_v9  ;;  %v4531_v58 = vld [vmem:[#allocation101_spill] sm:$0xff]  ;;  %v4538_v63 = vld [vmem:[#allocation91_spill] sm:$0xff] }
 0x131   :  { %v1931_v20 = vmul.f32 %v4516_v55, %v4477_v36  ;;  %v1916_v27 = vadd.f32 %v4517_v13, %v1899_v47  ;;  %v2015_v21 = vmul.f32 %v4518_v50, %v3387_v53  ;;  %v2069_v17 = vadd.f32 %v2067_v34, %v2001_v49  ;;  %v4534_v34 = vld [vmem:[#allocation19_spill] sm:$0xff]  ;;  %v4539_v55 = vld [vmem:[#allocation92_spill] sm:$0xff]  ;;  %v4541_v13 = vld [vmem:[#allocation105_spill] sm:$0xff] }
 0x132   :  { %v2030_v57 = vmul.f32 %v4519_v44, %v3437_v56  ;;  %v4521_v36 = vrot.slane %v4504_v60, %v2435_v9  ;;  %v4522_v10 = vrot.slane %v4506_v31, %v2435_v9  ;;  %v2103_v52 = vadd.f32 %v2101_v32, %v2035_v62  ;;  %v4525_v60 = vld [vmem:[#allocation15_spill] sm:$0xff]  ;;  %v4527_v31 = vld [vmem:[#allocation22_spill] sm:$0xff]  ;;  %v4540_v62 = vld [vmem:[#allocation49_spill] sm:$0xff] }
 0x133   :  { %v1948_v40 = vadd.f32 %v4520_v59, %v1931_v20  ;;  %v4523_v7 = vrot.slane %v4508_v41, %v2435_v9  ;;  %v4524_v5 = vrot.slane %v4510_v18, %v2435_v9  ;;  %v4526_v45 = vrot.slane %v4525_v60, %v2433_v8  ;;  %v4530_v18 = vld [vmem:[#allocation86_spill] sm:$0xff]  ;;  %v4543_v44 = vld [vmem:[#allocation96_spill] sm:$0xff] }
 0x134   :  { %v2049_v2 = vmul.f32 %v4521_v36, %v3475_v54  ;;  %v2064_v16 = vmul.f32 %v4522_v10, %v3566_v26  ;;  %v2032_v51 = vadd.f32 %v2030_v57, %v2015_v21  ;;  %v4528_v38 = vrot.slane %v4527_v31, %v2435_v9  ;;  %v4537_v32 = vld [vmem:[#allocation18_spill] sm:$0xff]  ;;  %v4545_v59 = vld [vmem:[#allocation100_spill] sm:$0xff] }
 0x135   :  { %v2083_v19 = vmul.f32 %v4523_v7, %v3518_v6  ;;  %v2098_v46 = vmul.f32 %v4524_v5, %v3600_v1  ;;  %v1094_v61 = vmul.f32 %v4526_v45, %v3328_v14  ;;  %v1950_v43 = vadd.f32 %v1948_v40, %v1884_v12  ;;  %v4546_v40 = vld [vmem:[#allocation89_spill] sm:$0xff]  ;;  %v4550_v60 = vld [vmem:[#allocation90_spill] sm:$0xff] }
 0x136   :  { %v1224_v30 = vmul.f32 %v4528_v38, %v3437_v56  ;;  %v2066_v22 = vadd.f32 %v2064_v16, %v2049_v2  ;;  %v4529_v41 = vrot.slane %v4527_v31, %v2433_v8  ;;  %v2105_v48 = vadd.f32 %v2103_v52, %v2069_v17  ;;  %v4544_v17 = vld [vmem:[#allocation116_spill] sm:$0xff]  ;;  %v4552_v38 = vld [vmem:[#allocation87_spill] sm:$0xff] }
 0x137   :  { %v2000_v42 = vadd.f32 %v4530_v18, %v1916_v27  ;;  %v2100_v28 = vadd.f32 %v2098_v46, %v2083_v19  ;;  %v4533_v14 = vrot.slane %v4532_v33, %v2433_v8  ;;  %v4535_v56 = vrot.slane %v4534_v34, %v2435_v9  ;;  %v4547_v16 = vld [vmem:[#allocation88_spill] sm:$0xff] }
 0x138   :  { %v1225_v23 = vmul.f32 %v4529_v41, %v4422_v37  ;;  %v4536_v47 = vrot.slane %v4534_v34, %v2433_v8  ;;  %v2034_v37 = vadd.f32 %v2032_v51, %v1950_v43  ;;  %2108 = vrot.lane.b32.xlu1 %v2105_v48, %s2317_s9  ;;  %v1078_v12 = vadd.f32 %v4538_v63, %v4537_v32  ;;  %v4548_v19 = vld [vmem:[#allocation84_spill] sm:$0xff]  ;;  %v4555_v48 = vld [vmem:[#allocation85_spill] sm:$0xff] }
 0x139   :  { %v1109_v4 = vmul.f32 %v4533_v14, %v4531_v58  ;;  %v1209_v25 = vmul.f32 %v4535_v56, %v3387_v53  ;;  %v2068_v49 = vadd.f32 %v2066_v22, %v2000_v42  ;;  %v1079_v20 = vadd.f32 %v4539_v55, %v1062_v35  ;;  %v4542_v53 = vld [vmem:[#allocation14_spill] sm:$0xff] }
 0x13a   :  { %v1210_v24 = vmul.f32 %v4536_v47, %v4419_v39  ;;  %v1110_v27 = vadd.f32 %v4541_v13, %v4540_v62  ;;  %v2102_v50 = vadd.f32 %v2100_v28, %v2034_v37  ;;  %v1142_v57 = vadd.f32 %v4543_v44, %v4542_v53  ;;  %v484_v62 = vld [vmem:[#allocation6] sm:$0x3]  ;;  %v1032_v13 = vld [vmem:[#allocation6 + $0x4] sm:$0x3]  ;;  %v1838_v53 = vld [vmem:[#allocation6 + $0xa] sm:$0x3] }
 0x13b   :  { %v1111_v21 = vadd.f32 %v1109_v4, %v1094_v61  ;;  %v1143_v39 = vadd.f32 %v4545_v59, %v4544_v17  ;;  %v1226_v2 = vadd.f32 %v1224_v30, %v1209_v25  ;;  %v1289_v52 = vrot.slane %v4547_v16, %v2433_v8 }
 0x13c   :  { %v1194_v36 = vadd.f32 %v4546_v40, %v1110_v27  ;;  %v1227_v10 = vadd.f32 %v1225_v23, %v1210_v24  ;;  %v2104_v51 = vadd.f32 %v2102_v50, %v2068_v49  ;;  %v1144_v35 = vadd.f32 %v1142_v57, %v1078_v12 }
 0x13d   :  { %v1145_v7 = vadd.f32 %v1143_v39, %v1079_v20  ;;  %v4549_v5 = vrot.slane %v4548_v19, %v2435_v9  ;;  %v1195_v45 = vadd.f32 %v4550_v60, %v1111_v21  ;;  %v4551_v61 = vrot.slane %v4548_v19, %v2433_v8 }
 0x13e   :  { %v4553_v30 = vrot.slane %v4552_v38, %v2435_v9  ;;  %v4554_v22 = vrot.slane %v4552_v38, %v2433_v8  ;;  %2106 = vrot.lane.b32.xlu0 %v2104_v51, %s2317_s9  ;;  %v1228_v23 = vadd.f32 %v1226_v2, %v1144_v35  ;;  %v4556_v18 = vrot.slane %v4555_v48, %v2435_v9 }
 0x13f   :  { %v1243_v46 = vmul.f32 %v4549_v5, %v3475_v54  ;;  %v1244_v31 = vmul.f32 %v4551_v61, %v4427_v11  ;;  %v1229_v54 = vadd.f32 %v1227_v10, %v1145_v7  ;;  %v4557_v11 = vrot.slane %v4547_v16, %v2435_v9 }
 0x140   :  { %v1258_v43 = vmul.f32 %v4553_v30, %v3566_v26  ;;  %v1259_v41 = vmul.f32 %v4554_v22, %v3570_v0  ;;  %v1277_v42 = vmul.f32 %v4556_v18, %v3518_v6  ;;  %v4558_v33 = vrot.slane %v4555_v48, %v2433_v8 }
 0x141   :  { %v1292_v28 = vmul.f32 %v4557_v11, %v3600_v1  ;;  %v1293_v14 = vmul.f32 %v1289_v52, %v3604_v29  ;;  %v1562_v29 = vld [vmem:[#allocation6 + $0x8] sm:$0x3]  ;;  %v489_v50 = vrot.slane %v484_v62, %v2435_v9  ;;  %v493_v21 = vrot.slane %v484_v62, %v2433_v8  ;;  %v2114_v52 = vld [vmem:[#allocation6 + $0xc] sm:$0x3] }
 0x142   :  { %v1260_v58 = vadd.f32 %v1258_v43, %v1243_v46  ;;  %v1261_v26 = vadd.f32 %v1259_v41, %v1244_v31  ;;  %v1278_v0 = vmul.f32 %v4558_v33, %v4433_v3  ;;  %v758_v3 = vld [vmem:[#allocation6 + $0x2] sm:$0x3]  ;;  %v1037_v44 = vrot.slane %v1032_v13, %v2435_v9 }
 0x143   :  { %v1294_v4 = vadd.f32 %v1292_v28, %v1277_v42  ;;  %v1041_v57 = vrot.slane %v1032_v13, %v2433_v8  ;;  %v763_v17 = vrot.slane %v758_v3, %v2435_v9  ;;  %v767_v59 = vrot.slane %v758_v3, %v2433_v8 }
 0x144   :  { %v1262_v34 = vadd.f32 %v1260_v58, %v1194_v36  ;;  %v1263_v56 = vadd.f32 %v1261_v26, %v1195_v45  ;;  %v1295_v25 = vadd.f32 %v1293_v14, %v1278_v0  ;;  %v1567_v39 = vrot.slane %v1562_v29, %v2435_v9 }
 0x145   :  { %v1296_v47 = vadd.f32 %v1294_v4, %v1228_v23  ;;  %v1571_v40 = vrot.slane %v1562_v29, %v2433_v8  ;;  %v1843_v16 = vrot.slane %v1838_v53, %v2435_v9  ;;  %v1847_v7 = vrot.slane %v1838_v53, %v2433_v8 }
 0x146   :  { %v1297_v6 = vadd.f32 %v1295_v25, %v1229_v54  ;;  %v2119_v38 = vrot.slane %v2114_v52, %v2435_v9  ;;  %v2123_v30 = vrot.slane %v2114_v52, %v2433_v8 }
 0x147   :  { %v1298_v24 = vadd.f32 %v1296_v47, %v1262_v34 }
 0x148   :  { %v1299_v37 = vadd.f32 %v1297_v6, %v1263_v56 }
 0x179   :  { %v480_v49 = vpop.permute.xlu1 %479  ;;  %v478_v32 = vpop.permute.xlu0 %477 }
 0x17a   :  { %v482_v5 = vsel %vm481_vm8, %v478_v32, %v480_v49  ;;  %v483_v46 = vsel %vm481_vm8, %v480_v49, %v478_v32 }
 0x17b   :  { %v496_v54 = vmul.f32 %v489_v50, %v483_v46  ;;  %v497_v48 = vmul.f32 %v493_v21, %v482_v5 }
 0x17d   :  { %v1027_v1 = vpop.permute.xlu1 %1026  ;;  %v1025_v63 = vpop.permute.xlu0 %1024 }
 0x17e   :  { %v1029_v2 = vsel %vm1028_vm9, %v1025_v63, %v1027_v1  ;;  %v1030_v10 = vsel %vm1028_vm9, %v1027_v1, %v1025_v63  ;;  %v2133_v63 = vstv %s4015_s0  ;;  %s2273_s0 = scalar_lea.vmem %s2167_s2, 64 }
 0x17f   :  { %v1044_v61 = vmul.f32 %v1037_v44, %v1030_v10  ;;  %v1045_v31 = vmul.f32 %v1041_v57, %v1029_v2  ;;  %p2274_p10 = scmp.ne.s32.totalorder %s2167_s2, %s2273_s0  ;;  %p2279_p12 = scmp.lt.s32.totalorder %s2273_s0, %s2273_s0 }
 0x181   :  { %v753_v12 = vpop.permute.xlu1 %752  ;;  %v1046_v28 = vadd.f32 %v1044_v61, %v496_v54  ;;  %v1047_v58 = vadd.f32 %v1045_v31, %v497_v48  ;;  %p2280_p13 = por %p2279_p12, %p2278_p11 }
 0x183   :  { %p2281_p0 = pnand %p2280_p13, %p2274_p10 }
 0x184   :  { %v751_v55 = vpop.permute.xlu0 %750 }
 0x185   :  { %v755_v51 = vsel %vm754_vm10, %v751_v55, %v753_v12  ;;  %v756_v35 = vsel %vm754_vm10, %v753_v12, %v751_v55 }
 0x186   :  { %v770_v43 = vmul.f32 %v763_v17, %v756_v35  ;;  %v771_v22 = vmul.f32 %v767_v59, %v755_v51 }
 0x188   :  { %v1300_v0 = vadd.f32 %v1298_v24, %v770_v43  ;;  %v1301_v8 = vadd.f32 %v1299_v37, %v771_v22 }
 0x18b   :  { %v1557_v20 = vpop.permute.xlu1 %1556 }
 0x192   :  { %v1555_v27 = vpop.permute.xlu0 %1554 }
 0x193   :  { %v1559_v60 = vsel %vm1558_vm11, %v1555_v27, %v1557_v20  ;;  %v1560_v45 = vsel %vm1558_vm11, %v1557_v20, %v1555_v27 }
 0x194   :  { %v1574_v18 = vmul.f32 %v1567_v39, %v1559_v60  ;;  %v1575_v42 = vmul.f32 %v1571_v40, %v1560_v45 }
 0x196   :  { %v1576_v34 = vadd.f32 %v1574_v18, %v1046_v28  ;;  %v1577_v56 = vadd.f32 %v1575_v42, %v1047_v58 }
 0x19a   :  { %v1833_v36 = vpop.permute.xlu1 %1832 }
 0x1a0   :  { %v1831_v19 = vpop.permute.xlu0 %1830 }
 0x1a1   :  { %v1835_v41 = vsel %vm1834_vm12, %v1831_v19, %v1833_v36  ;;  %v1836_v23 = vsel %vm1834_vm12, %v1833_v36, %v1831_v19 }
 0x1a2   :  { %v1850_v26 = vmul.f32 %v1843_v16, %v1835_v41  ;;  %v1851_v33 = vmul.f32 %v1847_v7, %v1836_v23 }
 0x1a4   :  { %v1852_v6 = vadd.f32 %v1850_v26, %v1300_v0  ;;  %v1853_v49 = vadd.f32 %v1851_v33, %v1301_v8 }
 0x1aa   :  { %v2109_v11 = vpop.permute.xlu1 %2108 }
 0x1b0   :  { %v2107_v9 = vpop.permute.xlu0 %2106 }
 0x1b1   :  { %v2111_v14 = vsel %vm2110_vm13, %v2107_v9, %v2109_v11  ;;  %v2112_v4 = vsel %vm2110_vm13, %v2109_v11, %v2107_v9 }
 0x1b2   :  { %v2126_v25 = vmul.f32 %v2119_v38, %v2111_v14  ;;  %v2127_v47 = vmul.f32 %v2123_v30, %v2112_v4 }
 0x1b4   :  { %v2128_v32 = vadd.f32 %v2126_v25, %v1576_v34  ;;  %v2129_v1 = vadd.f32 %v2127_v47, %v1577_v56 }
 0x1b6   :  { %v2130_v24 = vadd.f32 %v2128_v32, %v1852_v6  ;;  %v2131_v37 = vadd.f32 %v2129_v1, %v1853_v49 }
 0x1b8   :  { %v2134_v12 = vadd.f32 %v2133_v63, %v2130_v24  ;;  %v2135_v55 = vadd.f32 %v2133_v63, %v2131_v37 }
 0x1ba   :  { %v2176_v20 = vmul.f32 -1.442695, %v2134_v12  ;;  %v2177_v62 = vmul.f32 -1.442695, %v2135_v55 }
 0x1bc   :  { %2199 = vpow2.f32 %v2176_v20 }
 0x1bd   :  { %2201 = vpow2.f32 %v2177_v62 }
 0x1c6   :  { %v2200_v15 = vpop.eup %2199 }
 0x1c7   :  { %v2202_v13 = vpop.eup %2201  ;;  %v2142_v3 = vadd.f32 1.0, %v2200_v15 }
 0x1c8   :  { %v2143_v27 = vadd.f32 1.0, %v2202_v13 }
 0x1c9   :  { %2203 = vrcp.f32 %v2142_v3 }
 0x1ca   :  { %2205 = vrcp.f32 %v2143_v27 }
 0x1d3   :  { %v2204_v29 = vpop.eup %2203 }
 0x1d4   :  { %v2206_v50 = vpop.eup %2205 }
 0x1d5   :  { %v2150_v21 = vcombine.low %v2204_v29, %v2206_v50 }
 0x1d7   :  { %2178 = vst.sshfl [vmem:[#allocation9] sm:$0x33 pattern:$0x76325410] %v2150_v21 }
 0x1d8   :  { %2284 = shalt.err (!%p2281_p0)
}
 0x1d9   :  { %s2285_s15 = scalar_lea.hbm %s4019_s4, 64 }
 0x1da   :  { %p2286_p1 = scmp.ne.s32.totalorder %s4019_s4, %s2285_s15  ;;  %p2289_p2 = scmp.lt.u32.totalorder %s2285_s15, %s4019_s4 }
 0x1dc   :  { %p2291_p3 = pnand %p2289_p2, %p2286_p1 }
 0x1de   :  { %2294 = shalt.err (!%p2291_p3)
}
 0x1df   :  { %2169 = dma.vmem_to_hbm [thread:$0]  %s2167_s2, 64, %s4019_s4, [#allocation5]  }
 0x1e0   :  { %2299 = dma.done.wait [#allocation5], 64  }
 0x1e1   :  { %2300 = vsyncadd [#allocation5], 4294967232 }
 0x1e2   :  { %2173 = vsyncpa [#allocation4], 1 }
 0x1e3   :  { %2174 = vsyncpa [#allocation7], 1 }
 0x1e4   :  { %2175 = vsyncpa [#allocation5], 1 }

</bundles_post_ra>
